<compile_context>
chip_gen: v6e
topology: v6e:2x2x1
jax: 0.10.0
libtpu: 0.0.40
codegen_flags: <defaults>
</compile_context>

<pallas_src>
import numpy as np
import jax
import jax.numpy as jnp
from jax.experimental import pallas as pl
from jax.experimental.pallas import tpu as pltpu


# ----------------------------------------------------------------------------
# Anchor utilities (pure numpy glue, identical to the original implementation).
# ----------------------------------------------------------------------------
def generate_anchor_base(base_size=16, ratios=(0.5, 1, 2),
                         anchor_scales=(2, 4, 8, 16, 32)):
    py = base_size / 2.0
    px = base_size / 2.0
    anchor_base = np.zeros((len(ratios) * len(anchor_scales), 4), dtype=np.float32)
    for i in range(len(ratios)):
        for j in range(len(anchor_scales)):
            h = base_size * anchor_scales[j] * np.sqrt(ratios[i])
            w = base_size * anchor_scales[j] * np.sqrt(1.0 / ratios[i])
            index = i * len(anchor_scales) + j
            anchor_base[index, 0] = py - h / 2.0
            anchor_base[index, 1] = px - w / 2.0
            anchor_base[index, 2] = py + h / 2.0
            anchor_base[index, 3] = px + w / 2.0
    return anchor_base


def enumerate_shifted_anchor(anchor_base, feat_stride, height, width):
    shift_y = np.arange(0, height * feat_stride, feat_stride)
    shift_x = np.arange(0, width * feat_stride, feat_stride)
    shift_x, shift_y = np.meshgrid(shift_x, shift_y)
    shift = np.stack((shift_y.ravel(), shift_x.ravel(),
                      shift_y.ravel(), shift_x.ravel()), axis=1)
    A = anchor_base.shape[0]
    K = shift.shape[0]
    anchor = anchor_base.reshape((1, A, 4)) + \
        shift.reshape((1, K, 4)).transpose((1, 0, 2))
    return anchor.reshape((K * A, 4)).astype(np.float32)


def _round_up(x, m):
    return ((x + m - 1) // m) * m


# ----------------------------------------------------------------------------
# Pallas kernel: 3x3 conv (9 sublane-offset matmuls on the flat padded grid)
# + ReLU + fused (loc|score) 1x1 conv written to one lane-dense 128-wide block.
# ----------------------------------------------------------------------------
def _make_rpn_kernel(tile_rows, wp):
    def kernel(x_ref, w1_ref, b1_ref, wh_ref, bh_ref, out_ref, acc_ref):
        # x_ref  : (L, Cin)  f32, whole flattened padded image (resident)
        # w1_ref : (9, Cin, Cmid)       bf16
        # b1_ref : (1, Cmid)            f32
        # wh_ref : (Cmid, 128)          bf16  (loc|score fused, lane-padded)
        # bh_ref : (1, 128)             f32
        # out_ref: (tile_rows, 128)     f32   lane-dense store
        # acc_ref: (tile_rows, Cmid)    f32   VMEM scratch accumulator
        base = pl.program_id(1) * tile_rows
        for tap in range(9):
            dy, dx = divmod(tap, 3)
            # Tap (dy, dx) == constant flat offset dy*Wp + dx on the padded grid.
            patch = x_ref[pl.ds(base + dy * wp + dx, tile_rows), :]
            contrib = jnp.dot(patch.astype(jnp.bfloat16), w1_ref[tap],
                              preferred_element_type=jnp.float32)
            if tap == 0:
                acc_ref[...] = contrib          # init (no separate zero pass)
            else:
                acc_ref[...] += contrib
        h = jnp.maximum(acc_ref[...] + b1_ref[...], 0.0).astype(jnp.bfloat16)
        out_ref[...] = (jnp.dot(h, wh_ref[...], preferred_element_type=jnp.float32)
                        + bh_ref[...])
    return kernel


# ----------------------------------------------------------------------------
# Parameter init (normal_init(m, 0, 0.01): weights ~ N(0, 0.01), biases = 0).
# ----------------------------------------------------------------------------
def init_params(key, c_in, c_mid, n_anchor):
    k1, k2, k3 = jax.random.split(key, 3)
    return dict(
        w1=0.01 * jax.random.normal(k1, (3, 3, c_in, c_mid), jnp.float32),   # HWIO
        b1=jnp.zeros((1, c_mid), jnp.float32),
        wloc=0.01 * jax.random.normal(k2, (c_mid, n_anchor * 4), jnp.float32),
        bloc=jnp.zeros((1, n_anchor * 4), jnp.float32),
        wscore=0.01 * jax.random.normal(k3, (c_mid, n_anchor * 2), jnp.float32),
        bscore=jnp.zeros((1, n_anchor * 2), jnp.float32),
    )


# ----------------------------------------------------------------------------
# Forward wrapper (matches RegionProposalNetwork.forward up to ProposalCreator).
# ----------------------------------------------------------------------------
def rpn_forward(x_nchw, params, n_anchor, feat_stride=16, img_size=None,
                scale=1.0, tile_rows=256):
    n, c_in, hh, ww = x_nchw.shape
    c_mid = params["w1"].shape[-1]
    a4, a2 = n_anchor * 4, n_anchor * 2
    head = a4 + a2
    head_pad = _round_up(head, 128)          # lane-dense fused output width

    wp = ww + 2                              # padded width == flat row pitch
    m = hh * wp                              # flat output rows (2 junk cols/row)
    t = _round_up(min(tile_rows, m), 8)      # spatial tile (multiple of 8)
    num_tiles = -(-m // t)
    m_pad = num_tiles * t
    l_rows = m_pad + 2 * wp + 2              # flat input rows incl. tap slack

    # Layout glue: NCHW -> NHWC, zero pad H/W by 1, flatten spatial, extend with
    # zero rows so every tap read of every (incl. padded) output row is in
    # bounds.  XLA fuses transpose+pad+reshape into the single layout copy it
    # needs for NCHW->NHWC anyway (no extra full HBM round-trip).
    x_nhwc = jnp.transpose(x_nchw, (0, 2, 3, 1)).astype(jnp.float32)
    xpad = jnp.pad(x_nhwc, ((0, 0), (1, 1), (1, 1), (0, 0)))
    x_flat = xpad.reshape(n, (hh + 2) * wp, c_in)
    x_flat = jnp.pad(x_flat, ((0, 0), (0, l_rows - (hh + 2) * wp), (0, 0)))

    # bf16 weights; fuse loc|score 1x1 convs and pad to 128 output lanes.
    w1_k = params["w1"].reshape(9, c_in, c_mid).astype(jnp.bfloat16)
    b1 = params["b1"].reshape(1, c_mid).astype(jnp.float32)
    w_head = jnp.concatenate([params["wloc"], params["wscore"]], axis=1)
    w_head = jnp.pad(w_head, ((0, 0), (0, head_pad - head))).astype(jnp.bfloat16)
    b_head = jnp.concatenate([params["bloc"], params["bscore"]], axis=1)
    b_head = jnp.pad(b_head, ((0, 0), (0, head_pad - head))).astype(jnp.float32)

    kernel = _make_rpn_kernel(t, wp)

    out = pl.pallas_call(
        kernel,
        out_shape=jax.ShapeDtypeStruct((n, m_pad, head_pad), jnp.float32),
        grid=(n, num_tiles),
        in_specs=[
            # Whole flattened image resident across the spatial-tile axis.
            pl.BlockSpec((None, l_rows, c_in), lambda b, j: (b, 0, 0)),
            pl.BlockSpec((9, c_in, c_mid), lambda b, j: (0, 0, 0)),
            pl.BlockSpec((1, c_mid), lambda b, j: (0, 0)),
            pl.BlockSpec((c_mid, head_pad), lambda b, j: (0, 0)),
            pl.BlockSpec((1, head_pad), lambda b, j: (0, 0)),
        ],
        out_specs=pl.BlockSpec((None, t, head_pad), lambda b, j: (b, j, 0)),
        scratch_shapes=[pltpu.VMEM((t, c_mid), jnp.float32)],
        compiler_params=pltpu.CompilerParams(
            dimension_semantics=("parallel", "parallel"),
            vmem_limit_bytes=48 * 1024 * 1024),
    )(x_flat, w1_k, b1, w_head, b_head)

    # Strip flat-grid padding (junk cols x in [W, W+2), junk rows >= H*Wp) and
    # split the fused head with the exact (4A, 2A) column split -> PyTorch's
    # permute(0,2,3,1).view(...) ordering is preserved.
    out = out[:, :m, :].reshape(n, hh, wp, head_pad)[:, :, :ww, :]
    rpn_locs = out[..., :a4].reshape(n, hh * ww * n_anchor, 4)
    rpn_scores = out[..., a4:head].reshape(n, hh * ww * n_anchor, 2)
    rpn_fg_scores = rpn_scores[..., 1].reshape(n, -1)

    anchor = enumerate_shifted_anchor(generate_anchor_base(), feat_stride, hh, ww)

    # TODO(synk): proposal_layer (top-k + bbox decode + NMS) omitted; no rois.
    return rpn_locs, rpn_scores, rpn_fg_scores, anchor


# ----------------------------------------------------------------------------
# Pure-JAX reference with matching bf16 numerics (sanity check of the kernel).
# ----------------------------------------------------------------------------
def _reference(x_nchw, params, n_anchor):
    n, c_in, hh, ww = x_nchw.shape
    x = jnp.transpose(x_nchw, (0, 2, 3, 1)).astype(jnp.bfloat16)
    h = jax.lax.conv_general_dilated(
        x, params["w1"].astype(jnp.bfloat16), window_strides=(1, 1),
        padding="SAME", dimension_numbers=("NHWC", "HWIO", "NHWC"),
        preferred_element_type=jnp.float32)
    h = jnp.maximum(h + params["b1"].reshape(-1), 0.0).astype(jnp.bfloat16)
    loc = (jnp.einsum("nhwc,cd->nhwd", h, params["wloc"].astype(jnp.bfloat16),
                      preferred_element_type=jnp.float32)
           + params["bloc"].reshape(-1))
    score = (jnp.einsum("nhwc,cd->nhwd", h, params["wscore"].astype(jnp.bfloat16),
                        preferred_element_type=jnp.float32)
             + params["bscore"].reshape(-1))
    return (loc.reshape(n, hh * ww * n_anchor, 4),
            score.reshape(n, hh * ww * n_anchor, 2))


if __name__ == "__main__":
    # Small shapes consistent with the module (defaults are 1024/512 channels).
    N, C_IN, H, W = 2, 16, 16, 16
    C_MID = 32
    RATIOS = (0.5, 1, 2)
    ANCHOR_SCALES = (2, 4, 8, 16, 32)
    N_ANCHOR = len(RATIOS) * len(ANCHOR_SCALES)   # 15 -> loc 60 ch, score 30 ch
    FEAT_STRIDE = 16
    IMG_SIZE = (H * FEAT_STRIDE, W * FEAT_STRIDE)

    key = jax.random.PRNGKey(0)
    kx, kp = jax.random.split(key)
    x = jax.random.normal(kx, (N, C_IN, H, W), jnp.float32)   # NCHW like PyTorch
    params = init_params(kp, C_IN, C_MID, N_ANCHOR)

    # tile_rows=128 -> 3 spatial tiles per image: exercises the pipelined /
    # parallel spatial grid axis even at these tiny test shapes.
    rpn_locs, rpn_scores, rpn_fg_scores, anchor = rpn_forward(
        x, params, N_ANCHOR, feat_stride=FEAT_STRIDE, img_size=IMG_SIZE,
        scale=1.0, tile_rows=128)
    jax.block_until_ready((rpn_locs, rpn_scores, rpn_fg_scores))

    # Shape / numerics sanity checks against a pure-JAX reference.
    assert rpn_locs.shape == (N, H * W * N_ANCHOR, 4)
    assert rpn_scores.shape == (N, H * W * N_ANCHOR, 2)
    assert rpn_fg_scores.shape == (N, H * W * N_ANCHOR)
    assert anchor.shape == (H * W * N_ANCHOR, 4)

    ref_locs, ref_scores = _reference(x, params, N_ANCHOR)
    np.testing.assert_allclose(np.asarray(rpn_locs), np.asarray(ref_locs),
                               rtol=2e-2, atol=2e-3)
    np.testing.assert_allclose(np.asarray(rpn_scores), np.asarray(ref_scores),
                               rtol=2e-2, atol=2e-3)

    print("KERNEL_OK")
</pallas_src>

<mosaic_0001>
module attributes {stable_mosaic.version = 11 : i64} {
  func.func @kernel(%arg0: i32, %arg1: i32, %arg2: memref<1x422x16xf32, #tpu.memory_space<vmem>>, %arg3: memref<9x16x32xbf16, #tpu.memory_space<vmem>>, %arg4: memref<1x32xf32, #tpu.memory_space<vmem>>, %arg5: memref<32x128xbf16, #tpu.memory_space<vmem>>, %arg6: memref<1x128xf32, #tpu.memory_space<vmem>>, %arg7: memref<1x128x128xf32, #tpu.memory_space<vmem>>, %arg8: memref<128x32xf32, #tpu.memory_space<vmem>>) attributes {dimension_semantics = [#tpu.dimension_semantics<parallel>, #tpu.dimension_semantics<parallel>], iteration_bounds = array<i64: 2, 3>, scalar_prefetch = 0 : i64, scratch_operands = 1 : i64, tpu.core_type = #tpu.core_type<tc>, window_params = [{transform_indices = @transform_0, window_bounds = array<i64: 1, 422, 16>}, {pipeline_mode = #tpu.pipeline_mode<synchronous>, transform_indices = @transform_1, window_bounds = array<i64: 9, 16, 32>}, {pipeline_mode = #tpu.pipeline_mode<synchronous>, transform_indices = @transform_2, window_bounds = array<i64: 1, 32>}, {pipeline_mode = #tpu.pipeline_mode<synchronous>, transform_indices = @transform_3, window_bounds = array<i64: 32, 128>}, {pipeline_mode = #tpu.pipeline_mode<synchronous>, transform_indices = @transform_4, window_bounds = array<i64: 1, 128>}, {transform_indices = @transform_5, window_bounds = array<i64: 1, 128, 128>}]} {
    %c128_i32 = arith.constant 128 : i32
    %0 = arith.muli %arg1, %c128_i32 : i32
    %c0_i32 = arith.constant 0 : i32
    %1 = arith.addi %0, %c0_i32 : i32
    %c0_i32_0 = arith.constant 0 : i32
    %2 = arith.addi %1, %c0_i32_0 : i32
    %c0 = arith.constant 0 : index
    %3 = arith.index_cast %2 : i32 to index
    %c0_1 = arith.constant 0 : index
    %4 = vector.load %arg2[%c0, %3, %c0_1] : memref<1x422x16xf32, #tpu.memory_space<vmem>>, vector<1x128x16xf32>
    %5 = vector.shape_cast %4 : vector<1x128x16xf32> to vector<128x16xf32>
    %6 = arith.truncf %5 : vector<128x16xf32> to vector<128x16xbf16>
    %c0_2 = arith.constant 0 : index
    %c0_3 = arith.constant 0 : index
    %c0_4 = arith.constant 0 : index
    %7 = vector.load %arg3[%c0_2, %c0_3, %c0_4] : memref<9x16x32xbf16, #tpu.memory_space<vmem>>, vector<1x16x32xbf16>
    %8 = vector.shape_cast %7 : vector<1x16x32xbf16> to vector<16x32xbf16>
    %cst = arith.constant dense<0.000000e+00> : vector<128x32xf32>
    %9 = tpu.matmul %6, %8, %cst {dimension_numbers = #tpu.dot_dimension_numbers<[1], [0], [0], [1], [0, 0, 1, 1], [], []>} : vector<128x16xbf16>, vector<16x32xbf16>, vector<128x32xf32> -> vector<128x32xf32>
    %c0_5 = arith.constant 0 : index
    %c0_6 = arith.constant 0 : index
    %10 = vector.load %arg8[%c0_5, %c0_6] : memref<128x32xf32, #tpu.memory_space<vmem>>, vector<128x32xf32>
    tpu.vector_store %arg8[%c0_5, %c0_6], %9 {strides = array<i32>} : memref<128x32xf32, #tpu.memory_space<vmem>>, vector<128x32xf32>,
    %c0_i32_7 = arith.constant 0 : i32
    %11 = arith.addi %0, %c0_i32_7 : i32
    %c1_i32 = arith.constant 1 : i32
    %12 = arith.addi %11, %c1_i32 : i32
    %c0_8 = arith.constant 0 : index
    %13 = arith.index_cast %12 : i32 to index
    %c0_9 = arith.constant 0 : index
    %14 = vector.load %arg2[%c0_8, %13, %c0_9] : memref<1x422x16xf32, #tpu.memory_space<vmem>>, vector<1x128x16xf32>
    %15 = vector.shape_cast %14 : vector<1x128x16xf32> to vector<128x16xf32>
    %16 = arith.truncf %15 : vector<128x16xf32> to vector<128x16xbf16>
    %c1 = arith.constant 1 : index
    %c0_10 = arith.constant 0 : index
    %c0_11 = arith.constant 0 : index
    %17 = vector.load %arg3[%c1, %c0_10, %c0_11] : memref<9x16x32xbf16, #tpu.memory_space<vmem>>, vector<1x16x32xbf16>
    %18 = vector.shape_cast %17 : vector<1x16x32xbf16> to vector<16x32xbf16>
    %cst_12 = arith.constant dense<0.000000e+00> : vector<128x32xf32>
    %19 = tpu.matmul %16, %18, %cst_12 {dimension_numbers = #tpu.dot_dimension_numbers<[1], [0], [0], [1], [0, 0, 1, 1], [], []>} : vector<128x16xbf16>, vector<16x32xbf16>, vector<128x32xf32> -> vector<128x32xf32>
    %c0_13 = arith.constant 0 : index
    %c0_14 = arith.constant 0 : index
    %20 = vector.load %arg8[%c0_13, %c0_14] : memref<128x32xf32, #tpu.memory_space<vmem>>, vector<128x32xf32>
    %21 = arith.addf %20, %19 : vector<128x32xf32>
    %c0_15 = arith.constant 0 : index
    %c0_16 = arith.constant 0 : index
    %22 = vector.load %arg8[%c0_15, %c0_16] : memref<128x32xf32, #tpu.memory_space<vmem>>, vector<128x32xf32>
    tpu.vector_store %arg8[%c0_15, %c0_16], %21 {strides = array<i32>} : memref<128x32xf32, #tpu.memory_space<vmem>>, vector<128x32xf32>,
    %c0_i32_17 = arith.constant 0 : i32
    %23 = arith.addi %0, %c0_i32_17 : i32
    %c2_i32 = arith.constant 2 : i32
    %24 = arith.addi %23, %c2_i32 : i32
    %c0_18 = arith.constant 0 : index
    %25 = arith.index_cast %24 : i32 to index
    %c0_19 = arith.constant 0 : index
    %26 = vector.load %arg2[%c0_18, %25, %c0_19] : memref<1x422x16xf32, #tpu.memory_space<vmem>>, vector<1x128x16xf32>
    %27 = vector.shape_cast %26 : vector<1x128x16xf32> to vector<128x16xf32>
    %28 = arith.truncf %27 : vector<128x16xf32> to vector<128x16xbf16>
    %c2 = arith.constant 2 : index
    %c0_20 = arith.constant 0 : index
    %c0_21 = arith.constant 0 : index
    %29 = vector.load %arg3[%c2, %c0_20, %c0_21] : memref<9x16x32xbf16, #tpu.memory_space<vmem>>, vector<1x16x32xbf16>
    %30 = vector.shape_cast %29 : vector<1x16x32xbf16> to vector<16x32xbf16>
    %cst_22 = arith.constant dense<0.000000e+00> : vector<128x32xf32>
    %31 = tpu.matmul %28, %30, %cst_22 {dimension_numbers = #tpu.dot_dimension_numbers<[1], [0], [0], [1], [0, 0, 1, 1], [], []>} : vector<128x16xbf16>, vector<16x32xbf16>, vector<128x32xf32> -> vector<128x32xf32>
    %c0_23 = arith.constant 0 : index
    %c0_24 = arith.constant 0 : index
    %32 = vector.load %arg8[%c0_23, %c0_24] : memref<128x32xf32, #tpu.memory_space<vmem>>, vector<128x32xf32>
    %33 = arith.addf %32, %31 : vector<128x32xf32>
    %c0_25 = arith.constant 0 : index
    %c0_26 = arith.constant 0 : index
    %34 = vector.load %arg8[%c0_25, %c0_26] : memref<128x32xf32, #tpu.memory_space<vmem>>, vector<128x32xf32>
    tpu.vector_store %arg8[%c0_25, %c0_26], %33 {strides = array<i32>} : memref<128x32xf32, #tpu.memory_space<vmem>>, vector<128x32xf32>,
    %c18_i32 = arith.constant 18 : i32
    %35 = arith.addi %0, %c18_i32 : i32
    %c0_i32_27 = arith.constant 0 : i32
    %36 = arith.addi %35, %c0_i32_27 : i32
    %c0_28 = arith.constant 0 : index
    %37 = arith.index_cast %36 : i32 to index
    %c0_29 = arith.constant 0 : index
    %38 = vector.load %arg2[%c0_28, %37, %c0_29] : memref<1x422x16xf32, #tpu.memory_space<vmem>>, vector<1x128x16xf32>
    %39 = vector.shape_cast %38 : vector<1x128x16xf32> to vector<128x16xf32>
    %40 = arith.truncf %39 : vector<128x16xf32> to vector<128x16xbf16>
    %c3 = arith.constant 3 : index
    %c0_30 = arith.constant 0 : index
    %c0_31 = arith.constant 0 : index
    %41 = vector.load %arg3[%c3, %c0_30, %c0_31] : memref<9x16x32xbf16, #tpu.memory_space<vmem>>, vector<1x16x32xbf16>
    %42 = vector.shape_cast %41 : vector<1x16x32xbf16> to vector<16x32xbf16>
    %cst_32 = arith.constant dense<0.000000e+00> : vector<128x32xf32>
    %43 = tpu.matmul %40, %42, %cst_32 {dimension_numbers = #tpu.dot_dimension_numbers<[1], [0], [0], [1], [0, 0, 1, 1], [], []>} : vector<128x16xbf16>, vector<16x32xbf16>, vector<128x32xf32> -> vector<128x32xf32>
    %c0_33 = arith.constant 0 : index
    %c0_34 = arith.constant 0 : index
    %44 = vector.load %arg8[%c0_33, %c0_34] : memref<128x32xf32, #tpu.memory_space<vmem>>, vector<128x32xf32>
    %45 = arith.addf %44, %43 : vector<128x32xf32>
    %c0_35 = arith.constant 0 : index
    %c0_36 = arith.constant 0 : index
    %46 = vector.load %arg8[%c0_35, %c0_36] : memref<128x32xf32, #tpu.memory_space<vmem>>, vector<128x32xf32>
    tpu.vector_store %arg8[%c0_35, %c0_36], %45 {strides = array<i32>} : memref<128x32xf32, #tpu.memory_space<vmem>>, vector<128x32xf32>,
    %c18_i32_37 = arith.constant 18 : i32
    %47 = arith.addi %0, %c18_i32_37 : i32
    %c1_i32_38 = arith.constant 1 : i32
    %48 = arith.addi %47, %c1_i32_38 : i32
    %c0_39 = arith.constant 0 : index
    %49 = arith.index_cast %48 : i32 to index
    %c0_40 = arith.constant 0 : index
    %50 = vector.load %arg2[%c0_39, %49, %c0_40] : memref<1x422x16xf32, #tpu.memory_space<vmem>>, vector<1x128x16xf32>
    %51 = vector.shape_cast %50 : vector<1x128x16xf32> to vector<128x16xf32>
    %52 = arith.truncf %51 : vector<128x16xf32> to vector<128x16xbf16>
    %c4 = arith.constant 4 : index
    %c0_41 = arith.constant 0 : index
    %c0_42 = arith.constant 0 : index
    %53 = vector.load %arg3[%c4, %c0_41, %c0_42] : memref<9x16x32xbf16, #tpu.memory_space<vmem>>, vector<1x16x32xbf16>
    %54 = vector.shape_cast %53 : vector<1x16x32xbf16> to vector<16x32xbf16>
    %cst_43 = arith.constant dense<0.000000e+00> : vector<128x32xf32>
    %55 = tpu.matmul %52, %54, %cst_43 {dimension_numbers = #tpu.dot_dimension_numbers<[1], [0], [0], [1], [0, 0, 1, 1], [], []>} : vector<128x16xbf16>, vector<16x32xbf16>, vector<128x32xf32> -> vector<128x32xf32>
    %c0_44 = arith.constant 0 : index
    %c0_45 = arith.constant 0 : index
    %56 = vector.load %arg8[%c0_44, %c0_45] : memref<128x32xf32, #tpu.memory_space<vmem>>, vector<128x32xf32>
    %57 = arith.addf %56, %55 : vector<128x32xf32>
    %c0_46 = arith.constant 0 : index
    %c0_47 = arith.constant 0 : index
    %58 = vector.load %arg8[%c0_46, %c0_47] : memref<128x32xf32, #tpu.memory_space<vmem>>, vector<128x32xf32>
    tpu.vector_store %arg8[%c0_46, %c0_47], %57 {strides = array<i32>} : memref<128x32xf32, #tpu.memory_space<vmem>>, vector<128x32xf32>,
    %c18_i32_48 = arith.constant 18 : i32
    %59 = arith.addi %0, %c18_i32_48 : i32
    %c2_i32_49 = arith.constant 2 : i32
    %60 = arith.addi %59, %c2_i32_49 : i32
    %c0_50 = arith.constant 0 : index
    %61 = arith.index_cast %60 : i32 to index
    %c0_51 = arith.constant 0 : index
    %62 = vector.load %arg2[%c0_50, %61, %c0_51] : memref<1x422x16xf32, #tpu.memory_space<vmem>>, vector<1x128x16xf32>
    %63 = vector.shape_cast %62 : vector<1x128x16xf32> to vector<128x16xf32>
    %64 = arith.truncf %63 : vector<128x16xf32> to vector<128x16xbf16>
    %c5 = arith.constant 5 : index
    %c0_52 = arith.constant 0 : index
    %c0_53 = arith.constant 0 : index
    %65 = vector.load %arg3[%c5, %c0_52, %c0_53] : memref<9x16x32xbf16, #tpu.memory_space<vmem>>, vector<1x16x32xbf16>
    %66 = vector.shape_cast %65 : vector<1x16x32xbf16> to vector<16x32xbf16>
    %cst_54 = arith.constant dense<0.000000e+00> : vector<128x32xf32>
    %67 = tpu.matmul %64, %66, %cst_54 {dimension_numbers = #tpu.dot_dimension_numbers<[1], [0], [0], [1], [0, 0, 1, 1], [], []>} : vector<128x16xbf16>, vector<16x32xbf16>, vector<128x32xf32> -> vector<128x32xf32>
    %c0_55 = arith.constant 0 : index
    %c0_56 = arith.constant 0 : index
    %68 = vector.load %arg8[%c0_55, %c0_56] : memref<128x32xf32, #tpu.memory_space<vmem>>, vector<128x32xf32>
    %69 = arith.addf %68, %67 : vector<128x32xf32>
    %c0_57 = arith.constant 0 : index
    %c0_58 = arith.constant 0 : index
    %70 = vector.load %arg8[%c0_57, %c0_58] : memref<128x32xf32, #tpu.memory_space<vmem>>, vector<128x32xf32>
    tpu.vector_store %arg8[%c0_57, %c0_58], %69 {strides = array<i32>} : memref<128x32xf32, #tpu.memory_space<vmem>>, vector<128x32xf32>,
    %c36_i32 = arith.constant 36 : i32
    %71 = arith.addi %0, %c36_i32 : i32
    %c0_i32_59 = arith.constant 0 : i32
    %72 = arith.addi %71, %c0_i32_59 : i32
    %c0_60 = arith.constant 0 : index
    %73 = arith.index_cast %72 : i32 to index
    %c0_61 = arith.constant 0 : index
    %74 = vector.load %arg2[%c0_60, %73, %c0_61] : memref<1x422x16xf32, #tpu.memory_space<vmem>>, vector<1x128x16xf32>
    %75 = vector.shape_cast %74 : vector<1x128x16xf32> to vector<128x16xf32>
    %76 = arith.truncf %75 : vector<128x16xf32> to vector<128x16xbf16>
    %c6 = arith.constant 6 : index
    %c0_62 = arith.constant 0 : index
    %c0_63 = arith.constant 0 : index
    %77 = vector.load %arg3[%c6, %c0_62, %c0_63] : memref<9x16x32xbf16, #tpu.memory_space<vmem>>, vector<1x16x32xbf16>
    %78 = vector.shape_cast %77 : vector<1x16x32xbf16> to vector<16x32xbf16>
    %cst_64 = arith.constant dense<0.000000e+00> : vector<128x32xf32>
    %79 = tpu.matmul %76, %78, %cst_64 {dimension_numbers = #tpu.dot_dimension_numbers<[1], [0], [0], [1], [0, 0, 1, 1], [], []>} : vector<128x16xbf16>, vector<16x32xbf16>, vector<128x32xf32> -> vector<128x32xf32>
    %c0_65 = arith.constant 0 : index
    %c0_66 = arith.constant 0 : index
    %80 = vector.load %arg8[%c0_65, %c0_66] : memref<128x32xf32, #tpu.memory_space<vmem>>, vector<128x32xf32>
    %81 = arith.addf %80, %79 : vector<128x32xf32>
    %c0_67 = arith.constant 0 : index
    %c0_68 = arith.constant 0 : index
    %82 = vector.load %arg8[%c0_67, %c0_68] : memref<128x32xf32, #tpu.memory_space<vmem>>, vector<128x32xf32>
    tpu.vector_store %arg8[%c0_67, %c0_68], %81 {strides = array<i32>} : memref<128x32xf32, #tpu.memory_space<vmem>>, vector<128x32xf32>,
    %c36_i32_69 = arith.constant 36 : i32
    %83 = arith.addi %0, %c36_i32_69 : i32
    %c1_i32_70 = arith.constant 1 : i32
    %84 = arith.addi %83, %c1_i32_70 : i32
    %c0_71 = arith.constant 0 : index
    %85 = arith.index_cast %84 : i32 to index
    %c0_72 = arith.constant 0 : index
    %86 = vector.load %arg2[%c0_71, %85, %c0_72] : memref<1x422x16xf32, #tpu.memory_space<vmem>>, vector<1x128x16xf32>
    %87 = vector.shape_cast %86 : vector<1x128x16xf32> to vector<128x16xf32>
    %88 = arith.truncf %87 : vector<128x16xf32> to vector<128x16xbf16>
    %c7 = arith.constant 7 : index
    %c0_73 = arith.constant 0 : index
    %c0_74 = arith.constant 0 : index
    %89 = vector.load %arg3[%c7, %c0_73, %c0_74] : memref<9x16x32xbf16, #tpu.memory_space<vmem>>, vector<1x16x32xbf16>
    %90 = vector.shape_cast %89 : vector<1x16x32xbf16> to vector<16x32xbf16>
    %cst_75 = arith.constant dense<0.000000e+00> : vector<128x32xf32>
    %91 = tpu.matmul %88, %90, %cst_75 {dimension_numbers = #tpu.dot_dimension_numbers<[1], [0], [0], [1], [0, 0, 1, 1], [], []>} : vector<128x16xbf16>, vector<16x32xbf16>, vector<128x32xf32> -> vector<128x32xf32>
    %c0_76 = arith.constant 0 : index
    %c0_77 = arith.constant 0 : index
    %92 = vector.load %arg8[%c0_76, %c0_77] : memref<128x32xf32, #tpu.memory_space<vmem>>, vector<128x32xf32>
    %93 = arith.addf %92, %91 : vector<128x32xf32>
    %c0_78 = arith.constant 0 : index
    %c0_79 = arith.constant 0 : index
    %94 = vector.load %arg8[%c0_78, %c0_79] : memref<128x32xf32, #tpu.memory_space<vmem>>, vector<128x32xf32>
    tpu.vector_store %arg8[%c0_78, %c0_79], %93 {strides = array<i32>} : memref<128x32xf32, #tpu.memory_space<vmem>>, vector<128x32xf32>,
    %c36_i32_80 = arith.constant 36 : i32
    %95 = arith.addi %0, %c36_i32_80 : i32
    %c2_i32_81 = arith.constant 2 : i32
    %96 = arith.addi %95, %c2_i32_81 : i32
    %c0_82 = arith.constant 0 : index
    %97 = arith.index_cast %96 : i32 to index
    %c0_83 = arith.constant 0 : index
    %98 = vector.load %arg2[%c0_82, %97, %c0_83] : memref<1x422x16xf32, #tpu.memory_space<vmem>>, vector<1x128x16xf32>
    %99 = vector.shape_cast %98 : vector<1x128x16xf32> to vector<128x16xf32>
    %100 = arith.truncf %99 : vector<128x16xf32> to vector<128x16xbf16>
    %c8 = arith.constant 8 : index
    %c0_84 = arith.constant 0 : index
    %c0_85 = arith.constant 0 : index
    %101 = vector.load %arg3[%c8, %c0_84, %c0_85] : memref<9x16x32xbf16, #tpu.memory_space<vmem>>, vector<1x16x32xbf16>
    %102 = vector.shape_cast %101 : vector<1x16x32xbf16> to vector<16x32xbf16>
    %cst_86 = arith.constant dense<0.000000e+00> : vector<128x32xf32>
    %103 = tpu.matmul %100, %102, %cst_86 {dimension_numbers = #tpu.dot_dimension_numbers<[1], [0], [0], [1], [0, 0, 1, 1], [], []>} : vector<128x16xbf16>, vector<16x32xbf16>, vector<128x32xf32> -> vector<128x32xf32>
    %c0_87 = arith.constant 0 : index
    %c0_88 = arith.constant 0 : index
    %104 = vector.load %arg8[%c0_87, %c0_88] : memref<128x32xf32, #tpu.memory_space<vmem>>, vector<128x32xf32>
    %105 = arith.addf %104, %103 : vector<128x32xf32>
    %c0_89 = arith.constant 0 : index
    %c0_90 = arith.constant 0 : index
    %106 = vector.load %arg8[%c0_89, %c0_90] : memref<128x32xf32, #tpu.memory_space<vmem>>, vector<128x32xf32>
    tpu.vector_store %arg8[%c0_89, %c0_90], %105 {strides = array<i32>} : memref<128x32xf32, #tpu.memory_space<vmem>>, vector<128x32xf32>,
    %c0_91 = arith.constant 0 : index
    %c0_92 = arith.constant 0 : index
    %107 = vector.load %arg8[%c0_91, %c0_92] : memref<128x32xf32, #tpu.memory_space<vmem>>, vector<128x32xf32>
    %c0_93 = arith.constant 0 : index
    %c0_94 = arith.constant 0 : index
    %108 = vector.load %arg4[%c0_93, %c0_94] : memref<1x32xf32, #tpu.memory_space<vmem>>, vector<1x32xf32>
    %109 = vector.broadcast %108 : vector<1x32xf32> to vector<128x32xf32>
    %110 = arith.addf %107, %109 : vector<128x32xf32>
    %cst_95 = arith.constant 0.000000e+00 : f32
    %111 = vector.broadcast %cst_95 : f32 to vector<128x32xf32>
    %112 = arith.maximumf %110, %111 : vector<128x32xf32>
    %113 = arith.truncf %112 : vector<128x32xf32> to vector<128x32xbf16>
    %c0_96 = arith.constant 0 : index
    %c0_97 = arith.constant 0 : index
    %114 = vector.load %arg5[%c0_96, %c0_97] : memref<32x128xbf16, #tpu.memory_space<vmem>>, vector<32x128xbf16>
    %cst_98 = arith.constant dense<0.000000e+00> : vector<128x128xf32>
    %115 = tpu.matmul %113, %114, %cst_98 {dimension_numbers = #tpu.dot_dimension_numbers<[1], [0], [0], [1], [0, 0, 1, 1], [], []>} : vector<128x32xbf16>, vector<32x128xbf16>, vector<128x128xf32> -> vector<128x128xf32>
    %c0_99 = arith.constant 0 : index
    %c0_100 = arith.constant 0 : index
    %116 = vector.load %arg6[%c0_99, %c0_100] : memref<1x128xf32, #tpu.memory_space<vmem>>, vector<1x128xf32>
    %117 = vector.broadcast %116 : vector<1x128xf32> to vector<128x128xf32>
    %118 = arith.addf %115, %117 : vector<128x128xf32>
    %c0_101 = arith.constant 0 : index
    %c0_102 = arith.constant 0 : index
    %c0_103 = arith.constant 0 : index
    %119 = vector.load %arg7[%c0_101, %c0_102, %c0_103] : memref<1x128x128xf32, #tpu.memory_space<vmem>>, vector<1x128x128xf32>
    %120 = vector.shape_cast %119 : vector<1x128x128xf32> to vector<128x128xf32>
    %121 = vector.shape_cast %118 : vector<128x128xf32> to vector<1x128x128xf32>
    tpu.vector_store %arg7[%c0_101, %c0_102, %c0_103], %121 {strides = array<i32>} : memref<1x128x128xf32, #tpu.memory_space<vmem>>, vector<1x128x128xf32>,
    return
  }
  func.func @transform_0(%arg0: i32, %arg1: i32) -> (i32, i32, i32) {
    %c0_i32 = arith.constant 0 : i32
    %c0_i32_0 = arith.constant 0 : i32
    %c0_i32_1 = arith.constant 0 : i32
    return %arg0, %c0_i32, %c0_i32_0 : i32, i32, i32
  }
  func.func @transform_1(%arg0: i32, %arg1: i32) -> (i32, i32, i32) {
    %c0_i32 = arith.constant 0 : i32
    %c0_i32_0 = arith.constant 0 : i32
    %c0_i32_1 = arith.constant 0 : i32
    %c0_i32_2 = arith.constant 0 : i32
    return %c0_i32, %c0_i32_0, %c0_i32_1 : i32, i32, i32
  }
  func.func @transform_2(%arg0: i32, %arg1: i32) -> (i32, i32) {
    %c0_i32 = arith.constant 0 : i32
    %c0_i32_0 = arith.constant 0 : i32
    %c0_i32_1 = arith.constant 0 : i32
    return %c0_i32, %c0_i32_0 : i32, i32
  }
  func.func @transform_3(%arg0: i32, %arg1: i32) -> (i32, i32) {
    %c0_i32 = arith.constant 0 : i32
    %c0_i32_0 = arith.constant 0 : i32
    %c0_i32_1 = arith.constant 0 : i32
    return %c0_i32, %c0_i32_0 : i32, i32
  }
  func.func @transform_4(%arg0: i32, %arg1: i32) -> (i32, i32) {
    %c0_i32 = arith.constant 0 : i32
    %c0_i32_0 = arith.constant 0 : i32
    %c0_i32_1 = arith.constant 0 : i32
    return %c0_i32, %c0_i32_0 : i32, i32
  }
  func.func @transform_5(%arg0: i32, %arg1: i32) -> (i32, i32, i32) {
    %c0_i32 = arith.constant 0 : i32
    %c0_i32_0 = arith.constant 0 : i32
    return %arg0, %arg1, %c0_i32 : i32, i32, i32
  }
}

</mosaic_0001>

<bundles_post_ra>
// kernel: tpu_custom_call.1
= control target key start
LH: loop header
LB: loop body
LE: loop exit
PB: predicated region body
PF: predicated region fallthrough
CT: control target
= control target key end

     0   :  { %10 = vsyncpa [#allocation4], 0  ;;  %s3701_s0 = inlined_call_operand.vmem [shape: f32[2,422,16], index: 0, kind: input, shape index: {}]   ;;  %s3702_s1 = inlined_call_operand.vmem [shape: bf16[9,16,32], index: 1, kind: input, shape index: {}]   ;;  %s3703_s2 = inlined_call_operand.vmem [shape: f32[1,32], index: 2, kind: input, shape index: {}]   ;;  %s3704_s3 = inlined_call_operand.vmem [shape: bf16[32,128], index: 3, kind: input, shape index: {}]   ;;  %s3705_s4 = inlined_call_operand.vmem [shape: f32[1,128], index: 4, kind: input, shape index: {}]   ;;  %s3706_s5 = inlined_call_operand.hbm [shape: f32[2,384,128], index: 5, kind: output, shape index: {}]  }
   0x1   :  { %12 = vsyncpa [#allocation4 + $0x1], 0  ;;  %s3129_s18 = smov 0   ;;  %s3131_s19 = smov 0  }
   0x2   :  { %s3133_s20 = smov 0   ;;  %s3135_s21 = smov 0  }
   0x3   :  { %s3137_s22 = smov 0   ;;  %s3139_s23 = smov 0  }
   0x4   :  { %s3141_s24 = smov 0   ;;  %s3143_s25 = smov 0  }
   0x5 LB: > { %s2385_s26 = sadd.s32 4294967295, %s3094_s25   ;;  %s2386_s27 = sadd.s32 4294967294, %s3094_s25   ;;  %s3094_s25 = sphi %s3143_s25, %s18_s25   ;;  %s3090_s24 = sphi %s3141_s24, %s3715_s24   ;;  %s3086_s23 = sphi %s3139_s23, %s3714_s23   ;;  %s3082_s22 = sphi %s3137_s22, %s3713_s22   ;;  %s3078_s21 = sphi %s3135_s21, %s3712_s21   ;;  %s3074_s20 = sphi %s3133_s20, %s3711_s20   ;;  %s3070_s19 = sphi %s3131_s19, %s3710_s19   ;;  %s3066_s18 = sphi %s3129_s18, %s3709_s18  }
   0x6   : > { %s27_s28 = sadd.s32 1, %s3086_s23  ;;  %s30_s29 = sadd.s32 1, %s3090_s24 }
   0x7   : > { %p28_p0 = scmp.ge.s32.totalorder %s27_s28, 3  ;;  %p159_p1 = scmp.ne.s32.totalorder %s3074_s20, %s3070_s19 }
   0x8   : > { %p160_p2 = scmp.eq.s32.totalorder %s2385_s26, 5  ;;  %p165_p5 = scmp.ne.s32.totalorder %s3070_s19, %s3066_s18 }
   0x9   : > { %s3717_s28 = smov (%p28_p0, %s27_s28), 0  ;;  %s3719_s29 = smov (!%p28_p0, %s30_s29), %s3090_s24 }
   0xa   : > { %s145_s30 = ssub.s32 %s3086_s23, %s3717_s28  ;;  %p3180_p3 = por %p160_p2, %p159_p1 }
   0xb   : > { %p32_p4 = scmp.ge.s32.totalorder %s3719_s29, 2  ;;  %p166_p6 = scmp.eq.s32.totalorder %s2386_s27, 5 }
   0xc   : > { %p2389_p7 = scmp.ge.s32.totalorder %s3094_s25, 1  ;;  %p204_p9 = scmp.lt.s32.totalorder %s3094_s25, 7 }
   0xd   : > { %s3721_s29 = smov (%p32_p4, %s3719_s29), 0  ;;  %p3189_p8 = por %p166_p6, %p165_p5 }
   0xe   : > { %s144_s8 = ssub.s32 %s3090_s24, %s3721_s29  ;;  %s149_s9 = sadd.s32 1, %s3074_s20 }
   0xf   : > { %s146_s10 = sor.u32 %s145_s30, %s144_s8  ;;  %p205_p10 = pnand %p2389_p7, %p204_p9 }
  0x10   : > { %p147_p11 = scmp.eq.s32.totalorder %s146_s10, 0  ;;  %p232_p12 = scmp.lt.s32.totalorder (!%p205_p10), %s3082_s22, 1 }
  0x11   : > { %208 = sbr.rel (%p205_p10) target bundleno = 615 (0x267), region = 40  ;;  %s2392_s17 = sshll.u32 (!%p205_p10), %s3078_s21, 7 }
  0x12   : > { %s3198_s11 = scalar_select %p147_p11, %s3074_s20, %s149_s9  }
  0x13   : > { %s229_s27 = sand.u32 (!%p205_p10), 1, %s3070_s19   ;;  %s2917_s12 = smul.u32 (!%p205_p10), 48, %s3082_s22 }
  0x14   : > { %s3650_s26 = scalar_lea.sflag (!%p205_p10), [#allocation4], %s229_s27  ;;  %s3096_s8 = smov (!%p205_p10), [#allocation3]  }
  0x15   : > { %s3006_s9 = sshll.u32 (!%p205_p10), %s3096_s8, 4  ;;  %s3007_s9 = int_to_ptr.vmem [resolvable:$false] %s3006_s9 }
  0x16   : > { %v2991_v0 = vld [vmem:[%s3702_s1] sm:$0xff]   ;;  %s233_s14 = scalar_select %p232_p12, %s3082_s22, 1  ;;  %v2992_v1 = vld [vmem:[%s3702_s1 + $0x10] sm:$0xff]   ;;  %v2993_v2 = vld [vmem:[%s3702_s1 + $0x8] sm:$0xff]   ;;  %vm273_vm0 = vcmask 130048   ;;  %vm395_vm1 = vcmask 261120  }
  0x17   : > { %2734 = vmatprep.subr.bf16.mxu0 %v2991_v0  ;;  %v2994_v3 = vld [vmem:[%s3702_s1 + $0x18] sm:$0xff]   ;;  %2752 = vmatprep.subr.bf16.mxu1 %v2993_v2  ;;  %v3231_v15 = vld [vmem:[%s3702_s1 + $0x20] sm:$0xff]   ;;  %v3241_v21 = vld [vmem:[%s3702_s1 + $0x28] sm:$0xff]  }
  0x18   : > { %2735 = vmatpush3.bf16.msra.mxu0 %v2991_v0  ;;  %s2916_s30 = smul.u32 424, %s233_s14  ;;  %2753 = vmatpush3.bf16.msra.mxu1 %v2993_v2  ;;  %v2997_v63 = vld [vmem:[%s3702_s1 + $0x30] sm:$0xff]   ;;  %v3299_v2 = vld [vmem:[%s3702_s1 + $0x38] sm:$0xff]  }
  0x19   : > { %2770 = vmatprep.subr.bf16.mxu0 %v2992_v1  ;;  %2788 = vmatprep.subr.bf16.mxu1 %v2994_v3 }
  0x1a   : > { %s236_s13 = scalar_lea.vmem %s3701_s0, %s2916_s30  ;;  %s2390_s30 = sshll.u32 %s229_s27, 7 }
  0x1b   : > { %s3218_s15 = scalar_lea.vmem %s236_s13, %s2392_s17  ;;  %s3620_s10 = scalar_lea.vmem [#allocation3], %s2390_s30 }
  0x1c   : > { %v241_v4 = vld [vmem:[%s3218_s15] sm:$0xff]  ;;  %v242_v5 = vld [vmem:[%s3218_s15 + $0x8] sm:$0xff]  ;;  %v243_v6 = vld [vmem:[%s3218_s15 + $0x10] sm:$0xff]  ;;  %s2639_s13 = sshll.u32 %s3078_s21, 4  ;;  %s2283_s22 = sshll.u32 %s3620_s10, 4  ;;  %s3644_s22 = int_to_ptr.vmem [resolvable:$true] %s2283_s22 }
  0x1d   : > { %v257_v7 = vpack.c.bf16 %v242_v5, %v241_v4  ;;  %v244_v8 = vld [vmem:[%s3218_s15 + $0x18] sm:$0xff]  ;;  %v245_v9 = vld [vmem:[%s3218_s15 + $0x20] sm:$0xff]  ;;  %v246_v10 = vld [vmem:[%s3218_s15 + $0x28] sm:$0xff]  ;;  %s2280_s14 = sadd.s32 %s2917_s12, %s2639_s13  ;;  %s3002_s30 = scalar_lea.vmem %s3644_s22, 2048 }
  0x1e   : > { %v258_v11 = vpack.c.bf16 %v244_v8, %v243_v6  ;;  %v259_v12 = vpack.c.bf16 %v246_v10, %v245_v9  ;;  %v2403_v13 = vld [vmem:[%s3218_s15 + $0x1] sm:$0xff]  ;;  %v2404_v14 = vld [vmem:[%s3218_s15 + $0x9] sm:$0xff]  ;;  %v2405_v17 = vld [vmem:[%s3218_s15 + $0x11] sm:$0xff]  ;;  %p3003_p13 = scmp.ne.s32.totalorder %s3644_s22, %s3002_s30  ;;  %s3008_s12 = scalar_lea.vmem %s3007_s9, 4096 }
  0x1f   : > { %2736 = vmatprep.mubr.msk.bf16.mxu0 %vm273_vm0, %v257_v7  ;;  %v430_v16 = vpack.c.bf16 %v2404_v14, %v2403_v13  ;;  %v2406_v18 = vld [vmem:[%s3218_s15 + $0x19] sm:$0xff]  ;;  %v2407_v20 = vld [vmem:[%s3218_s15 + $0x21] sm:$0xff]  ;;  %v247_v22 = vld [vmem:[%s3218_s15 + $0x30] sm:$0xff]  ;;  %p3009_p2 = scmp.lt.s32.totalorder %s3644_s22, %s3007_s9  ;;  %p3010_p4 = scmp.lt.s32.totalorder %s3008_s12, %s3002_s30 }
  0x20   : > { %2737 = vmatmul.mubr.msk.bf16.vlgmr.msra.gmra.mxu0 %vm273_vm0, %v258_v11  ;;  %v431_v19 = vpack.c.bf16 %v2406_v18, %v2405_v17  ;;  %v248_v23 = vld [vmem:[%s3218_s15 + $0x38] sm:$0xff]  ;;  %v2408_v24 = vld [vmem:[%s3218_s15 + $0x29] sm:$0xff]  ;;  %v249_v25 = vld [vmem:[%s3218_s15 + $0x40] sm:$0xff]  ;;  %p3004_p0 = pnand %p3003_p13, %p3180_p3 }
  0x21   : > { %2771 = vmatpush3.bf16.msra.mxu0 %v2992_v1  ;;  %2740 = vmatprep.mubr.msk.bf16.mxu0 %vm273_vm0, %v259_v12  ;;  %v250_v26 = vld [vmem:[%s3218_s15 + $0x48] sm:$0xff]  ;;  %v432_v27 = vpack.c.bf16 %v2408_v24, %v2407_v20  ;;  %v260_v28 = vpack.c.bf16 %v248_v23, %v247_v22  ;;  %v2409_v29 = vld [vmem:[%s3218_s15 + $0x31] sm:$0xff]  ;;  %v2410_v30 = vld [vmem:[%s3218_s15 + $0x39] sm:$0xff]  ;;  %p3011_p5 = por %p3010_p4, %p3009_p2 }
  0x22   : > { %2754 = vmatprep.mubr.msk.bf16.mxu1 %vm273_vm0, %v430_v16  ;;  %2806 = vmatprep.subr.bf16.mxu0 %v3231_v15  ;;  %v261_v31 = vpack.c.bf16 %v250_v26, %v249_v25  ;;  %v2411_v32 = vld [vmem:[%s3218_s15 + $0x41] sm:$0xff]  ;;  %v2412_v33 = vld [vmem:[%s3218_s15 + $0x49] sm:$0xff]  ;;  %v433_v34 = vpack.c.bf16 %v2410_v30, %v2409_v29  ;;  %v252_v37 = vld [vmem:[%s3218_s15 + $0x58] sm:$0xff]  ;;  %p3005_p1 = pneg %p3004_p0 }
  0x23   : > { %2755 = vmatmul.mubr.msk.bf16.vlgmr.msra.gmra.mxu1 %vm273_vm0, %v431_v19  ;;  %v434_v35 = vpack.c.bf16 %v2412_v33, %v2411_v32  ;;  %v251_v36 = vld [vmem:[%s3218_s15 + $0x50] sm:$0xff]  ;;  %v253_v38 = vld [vmem:[%s3218_s15 + $0x60] sm:$0xff]  ;;  %v254_v39 = vld [vmem:[%s3218_s15 + $0x68] sm:$0xff] }
  0x24   : > { %2758 = vmatprep.mubr.msk.bf16.mxu1 %vm273_vm0, %v432_v27  ;;  %2789 = vmatpush3.bf16.msra.mxu1 %v2994_v3  ;;  %v262_v40 = vpack.c.bf16 %v252_v37, %v251_v36  ;;  %v2413_v41 = vld [vmem:[%s3218_s15 + $0x51] sm:$0xff]  ;;  %v2414_v42 = vld [vmem:[%s3218_s15 + $0x59] sm:$0xff]  ;;  %v263_v43 = vpack.c.bf16 %v254_v39, %v253_v38  ;;  %v2415_v44 = vld [vmem:[%s3218_s15 + $0x61] sm:$0xff]  ;;  %p3012_p6 = pnand %p3011_p5, %p3005_p1 }
  0x25   : > { %2824 = vmatprep.subr.bf16.mxu1 %v3241_v21  ;;  %v2416_v45 = vld [vmem:[%s3218_s15 + $0x69] sm:$0xff]  ;;  %v435_v46 = vpack.c.bf16 %v2414_v42, %v2413_v41  ;;  %v256_v49 = vld [vmem:[%s3218_s15 + $0x78] sm:$0xff] }
  0x26   : > { %v436_v47 = vpack.c.bf16 %v2416_v45, %v2415_v44  ;;  %v255_v48 = vld [vmem:[%s3218_s15 + $0x70] sm:$0xff]  ;;  %v2431_v50 = vld [vmem:[%s3218_s15 + $0x2] sm:$0xff]  ;;  %v2418_v54 = vld [vmem:[%s3218_s15 + $0x79] sm:$0xff] }
  0x27   : > { %v2432_v51 = vld [vmem:[%s3218_s15 + $0xa] sm:$0xff]  ;;  %v264_v52 = vpack.c.bf16 %v256_v49, %v255_v48  ;;  %v2433_v57 = vld [vmem:[%s3218_s15 + $0x12] sm:$0xff]  ;;  %v2434_v58 = vld [vmem:[%s3218_s15 + $0x1a] sm:$0xff] }
  0x28   : > { %2741 = vmatmul.mubr.msk.bf16.gmra.mxu0 %vm273_vm0, %v260_v28  ;;  %v2417_v53 = vld [vmem:[%s3218_s15 + $0x71] sm:$0xff]  ;;  %v634_v55 = vpack.c.bf16 %v2432_v51, %v2431_v50  ;;  %v635_v59 = vpack.c.bf16 %v2434_v58, %v2433_v57  ;;  %v2435_v60 = vld [vmem:[%s3218_s15 + $0x22] sm:$0xff]  ;;  %v2438_v1 = vld [vmem:[%s3218_s15 + $0x3a] sm:$0xff] }
  0x29   : > { %2744 = vmatprep.mubr.msk.bf16.mxu0 %vm273_vm0, %v261_v31  ;;  %v437_v56 = vpack.c.bf16 %v2418_v54, %v2417_v53  ;;  %v2436_v61 = vld [vmem:[%s3218_s15 + $0x2a] sm:$0xff]  ;;  %v2437_v0 = vld [vmem:[%s3218_s15 + $0x32] sm:$0xff]  ;;  %v2439_v4 = vld [vmem:[%s3218_s15 + $0x42] sm:$0xff] }
  0x2a   : > { %v636_v62 = vpack.c.bf16 %v2436_v61, %v2435_v60  ;;  %v637_v3 = vpack.c.bf16 %v2438_v1, %v2437_v0  ;;  %v2440_v5 = vld [vmem:[%s3218_s15 + $0x4a] sm:$0xff]  ;;  %v2441_v7 = vld [vmem:[%s3218_s15 + $0x52] sm:$0xff]  ;;  %v2442_v8 = vld [vmem:[%s3218_s15 + $0x5a] sm:$0xff] }
  0x2b   : > { %2759 = vmatmul.mubr.msk.bf16.gmra.mxu1 %vm273_vm0, %v433_v34  ;;  %v638_v6 = vpack.c.bf16 %v2440_v5, %v2439_v4  ;;  %v639_v9 = vpack.c.bf16 %v2442_v8, %v2441_v7  ;;  %v2443_v10 = vld [vmem:[%s3218_s15 + $0x62] sm:$0xff]  ;;  %v2444_v11 = vld [vmem:[%s3218_s15 + $0x6a] sm:$0xff]  ;;  %v2445_v13 = vld [vmem:[%s3218_s15 + $0x72] sm:$0xff] }
  0x2c   : > { %2762 = vmatprep.mubr.msk.bf16.mxu1 %vm273_vm0, %v434_v35  ;;  %v640_v12 = vpack.c.bf16 %v2444_v11, %v2443_v10  ;;  %v2446_v14 = vld [vmem:[%s3218_s15 + $0x7a] sm:$0xff]  ;;  %v2473_v18 = vld [vmem:[%s3218_s15 + $0x82] sm:$0xff]  ;;  %v2474_v19 = vld [vmem:[%s3218_s15 + $0x8a] sm:$0xff] }
  0x2d   : > { %v2487_v16 = vld [vmem:[%s3218_s15 + $0x13] sm:$0xff]  ;;  %v2488_v17 = vld [vmem:[%s3218_s15 + $0x1b] sm:$0xff]  ;;  %v845_v23 = vpack.c.bf16 %v2474_v19, %v2473_v18  ;;  %v2489_v25 = vld [vmem:[%s3218_s15 + $0x23] sm:$0xff] }
  0x2e   : > { %v1042_v20 = vpack.c.bf16 %v2488_v17, %v2487_v16  ;;  %v2516_v22 = vld [vmem:[%s3218_s15 + $0x1c] sm:$0xff]  ;;  %v2490_v26 = vld [vmem:[%s3218_s15 + $0x2b] sm:$0xff]  ;;  %v2491_v27 = vld [vmem:[%s3218_s15 + $0x33] sm:$0xff] }
  0x2f   : > { %v2492_v28 = vld [vmem:[%s3218_s15 + $0x3b] sm:$0xff]  ;;  %v1043_v29 = vpack.c.bf16 %v2490_v26, %v2489_v25  ;;  %v2517_v30 = vld [vmem:[%s3218_s15 + $0x24] sm:$0xff]  ;;  %v2518_v31 = vld [vmem:[%s3218_s15 + $0x2c] sm:$0xff] }
  0x30   : > { %2745 = vmatmul.mubr.msk.bf16.gmra.mxu0 %vm273_vm0, %v262_v40  ;;  %v1044_v32 = vpack.c.bf16 %v2492_v28, %v2491_v27  ;;  %v2519_v33 = vld [vmem:[%s3218_s15 + $0x34] sm:$0xff]  ;;  %v2520_v34 = vld [vmem:[%s3218_s15 + $0x3c] sm:$0xff]  ;;  %v1247_v36 = vpack.c.bf16 %v2518_v31, %v2517_v30  ;;  %v2494_v39 = vld [vmem:[%s3218_s15 + $0x4b] sm:$0xff] }
  0x31   : > { %2748 = vmatprep.mubr.msk.bf16.mxu0 %vm273_vm0, %v263_v43  ;;  %v2999_v35 = vld [vmem:[%s3702_s1 + $0x40] sm:$0xff]   ;;  %v1248_v37 = vpack.c.bf16 %v2520_v34, %v2519_v33  ;;  %v2495_v40 = vld [vmem:[%s3218_s15 + $0x53] sm:$0xff]  ;;  %v2498_v51 = vld [vmem:[%s3218_s15 + $0x6b] sm:$0xff] }
  0x32   : > { %v2493_v38 = vld [vmem:[%s3218_s15 + $0x43] sm:$0xff]  ;;  %v2496_v41 = vld [vmem:[%s3218_s15 + $0x5b] sm:$0xff]  ;;  %v2522_v44 = vld [vmem:[%s3218_s15 + $0x4c] sm:$0xff] }
  0x33   : > { %2763 = vmatmul.mubr.msk.bf16.gmra.mxu1 %vm273_vm0, %v435_v46  ;;  %v1045_v42 = vpack.c.bf16 %v2494_v39, %v2493_v38  ;;  %v2521_v43 = vld [vmem:[%s3218_s15 + $0x44] sm:$0xff]  ;;  %v1046_v45 = vpack.c.bf16 %v2496_v41, %v2495_v40  ;;  %v2523_v46 = vld [vmem:[%s3218_s15 + $0x54] sm:$0xff]  ;;  %v2558_v26 = vld [vmem:[%s3218_s15 + $0x9c] sm:$0xff] }
  0x34   : > { %2766 = vmatprep.mubr.msk.bf16.mxu1 %vm273_vm0, %v436_v47  ;;  %v2524_v47 = vld [vmem:[%s3218_s15 + $0x5c] sm:$0xff]  ;;  %v1249_v48 = vpack.c.bf16 %v2522_v44, %v2521_v43  ;;  %v2527_v58 = vld [vmem:[%s3218_s15 + $0x74] sm:$0xff]  ;;  %v2529_v1 = vld [vmem:[%s3218_s15 + $0x84] sm:$0xff] }
  0x35   : > { %v1250_v49 = vpack.c.bf16 %v2524_v47, %v2523_v46  ;;  %v2497_v50 = vld [vmem:[%s3218_s15 + $0x63] sm:$0xff]  ;;  %v2500_v53 = vld [vmem:[%s3218_s15 + $0x7b] sm:$0xff]  ;;  %v2572_v4 = vld [vmem:[%s3218_s15 + $0x2d] sm:$0xff] }
  0x36   : > { %v1047_v54 = vpack.c.bf16 %v2498_v51, %v2497_v50  ;;  %v2573_v7 = vld [vmem:[%s3218_s15 + $0x35] sm:$0xff]  ;;  %v2574_v8 = vld [vmem:[%s3218_s15 + $0x3d] sm:$0xff]  ;;  %v2576_v10 = vld [vmem:[%s3218_s15 + $0x4d] sm:$0xff] }
  0x37   : > { %v1655_v11 = vpack.c.bf16 %v2574_v8, %v2573_v7  ;;  %v2580_v16 = vld [vmem:[%s3218_s15 + $0x6d] sm:$0xff]  ;;  %v2581_v19 = vld [vmem:[%s3218_s15 + $0x75] sm:$0xff]  ;;  %v2586_v31 = vld [vmem:[%s3218_s15 + $0x9d] sm:$0xff] }
  0x38   : > { %2749 = vmatmul.mubr.msk.bf16.gmra.mxu0 %vm273_vm0, %v264_v52  ;;  %v2499_v52 = vld [vmem:[%s3218_s15 + $0x73] sm:$0xff]  ;;  %v2599_v27 = vld [vmem:[%s3218_s15 + $0x26] sm:$0xff]  ;;  %v2606_v41 = vld [vmem:[%s3218_s15 + $0x5e] sm:$0xff] }
  0x39   : > { %2772 = vmatprep.mubr.msk.bf16.mxu0 %vm273_vm0, %v634_v55  ;;  %v2525_v55 = vld [vmem:[%s3218_s15 + $0x64] sm:$0xff]  ;;  %v1048_v57 = vpack.c.bf16 %v2500_v53, %v2499_v52  ;;  %v2557_v25 = vld [vmem:[%s3218_s15 + $0x94] sm:$0xff] }
  0x3a   : > { %v2600_v28 = vld [vmem:[%s3218_s15 + $0x2e] sm:$0xff]  ;;  %v2601_v34 = vld [vmem:[%s3218_s15 + $0x36] sm:$0xff]  ;;  %v2610_v47 = vld [vmem:[%s3218_s15 + $0x7e] sm:$0xff] }
  0x3b   : > { %2767 = vmatmul.mubr.msk.bf16.gmra.mxu1 %vm273_vm0, %v437_v56  ;;  %v2526_v56 = vld [vmem:[%s3218_s15 + $0x6c] sm:$0xff]  ;;  %v2585_v30 = vld [vmem:[%s3218_s15 + $0x95] sm:$0xff]  ;;  %v2614_v53 = vld [vmem:[%s3218_s15 + $0x9e] sm:$0xff] }
  0x3c   : > { %2790 = vmatprep.mubr.msk.bf16.mxu1 %vm273_vm0, %v635_v59  ;;  %v1251_v60 = vpack.c.bf16 %v2526_v56, %v2525_v55  ;;  %v1661_v33 = vpack.c.bf16 %v2586_v31, %v2585_v30  ;;  %v2605_v40 = vld [vmem:[%s3218_s15 + $0x56] sm:$0xff]  ;;  %v2608_v43 = vld [vmem:[%s3218_s15 + $0x6e] sm:$0xff] }
  0x3d   : > { %v1861_v44 = vpack.c.bf16 %v2606_v41, %v2605_v40  ;;  %v2609_v46 = vld [vmem:[%s3218_s15 + $0x76] sm:$0xff]  ;;  %v3000_v55 = vld [vmem:[%s3704_s3 + $0x8] sm:$0xff]  }
  0x3e   : > { %v1863_v50 = vpack.c.bf16 %v2610_v47, %v2609_v46  ;;  %v2613_v52 = vld [vmem:[%s3218_s15 + $0x96] sm:$0xff] }
  0x40   : > { %2773 = vmatmul.mubr.msk.bf16.vlgmr.msra.gmra.mxu0 %vm273_vm0, %v635_v59  ;;  %v2528_v59 = vld [vmem:[%s3218_s15 + $0x7c] sm:$0xff] }
  0x41   : > { %2807 = vmatpush3.bf16.msra.mxu0 %v3231_v15  ;;  %2776 = vmatprep.mubr.msk.bf16.mxu0 %vm273_vm0, %v636_v62  ;;  %v641_v15 = vpack.c.bf16 %v2446_v14, %v2445_v13  ;;  %v1252_v61 = vpack.c.bf16 %v2528_v59, %v2527_v58  ;;  %v2577_v13 = vld [vmem:[%s3218_s15 + $0x55] sm:$0xff]  ;;  %v2578_v14 = vld [vmem:[%s3218_s15 + $0x5d] sm:$0xff] }
  0x42   : > { %2842 = vmatprep.subr.bf16.mxu0 %v2997_v63  ;;  %v1657_v17 = vpack.c.bf16 %v2578_v14, %v2577_v13 }
  0x43   : > { %2791 = vmatmul.mubr.msk.bf16.vlgmr.msra.gmra.mxu1 %vm273_vm0, %v636_v62  ;;  %v2501_v62 = vld [vmem:[%s3218_s15 + $0x83] sm:$0xff] }
  0x44   : > { %2794 = vmatprep.mubr.msk.bf16.mxu1 %vm273_vm0, %v637_v3  ;;  %2825 = vmatpush3.bf16.msra.mxu1 %v3241_v21  ;;  %v2515_v21 = vld [vmem:[%s3218_s15 + $0x14] sm:$0xff] }
  0x45   : > { %2860 = vmatprep.subr.bf16.mxu1 %v3299_v2  ;;  %v1246_v24 = vpack.c.bf16 %v2516_v22, %v2515_v21  ;;  %v2583_v21 = vld [vmem:[%s3218_s15 + $0x85] sm:$0xff]  ;;  %v2584_v22 = vld [vmem:[%s3218_s15 + $0x8d] sm:$0xff] }
  0x48   : > { %2777 = vmatmul.mubr.msk.bf16.gmra.mxu0 %vm273_vm0, %v637_v3  ;;  %v2571_v3 = vld [vmem:[%s3218_s15 + $0x25] sm:$0xff] }
  0x49   : > { %2780 = vmatprep.mubr.msk.bf16.mxu0 %vm273_vm0, %v638_v6 }
  0x4b   : > { %2795 = vmatmul.mubr.msk.bf16.gmra.mxu1 %vm273_vm0, %v638_v6  ;;  %v1654_v6 = vpack.c.bf16 %v2572_v4, %v2571_v3  ;;  %v3001_v3 = vld [vmem:[%s3704_s3] sm:$0xff]  }
  0x4c   : > { %2798 = vmatprep.mubr.msk.bf16.mxu1 %vm273_vm0, %v639_v9 }
  0x50   : > { %2781 = vmatmul.mubr.msk.bf16.gmra.mxu0 %vm273_vm0, %v639_v9  ;;  %v2575_v9 = vld [vmem:[%s3218_s15 + $0x45] sm:$0xff] }
  0x51   : > { %2784 = vmatprep.mubr.msk.bf16.mxu0 %vm273_vm0, %v640_v12 }
  0x53   : > { %2799 = vmatmul.mubr.msk.bf16.gmra.mxu1 %vm273_vm0, %v640_v12  ;;  %v1656_v12 = vpack.c.bf16 %v2576_v10, %v2575_v9 }
  0x54   : > { %2802 = vmatprep.mubr.msk.bf16.mxu1 %vm273_vm0, %v641_v15 }
  0x58   : > { %2785 = vmatmul.mubr.msk.bf16.gmra.mxu0 %vm273_vm0, %v641_v15  ;;  %v2579_v15 = vld [vmem:[%s3218_s15 + $0x65] sm:$0xff] }
  0x59   : > { %2808 = vmatprep.mubr.msk.bf16.mxu0 %vm273_vm0, %v1042_v20  ;;  %v1658_v18 = vpack.c.bf16 %v2580_v16, %v2579_v15  ;;  %v2582_v20 = vld [vmem:[%s3218_s15 + $0x7d] sm:$0xff] }
  0x5b   : > { %2803 = vmatmul.mubr.msk.bf16.gmra.mxu1 %vm273_vm0, %v845_v23  ;;  %v1659_v23 = vpack.c.bf16 %v2582_v20, %v2581_v19 }
  0x5c   : > { %2826 = vmatprep.mubr.msk.bf16.mxu1 %vm273_vm0, %v1246_v24  ;;  %v1660_v24 = vpack.c.bf16 %v2584_v22, %v2583_v21 }
  0x60   : > { %2809 = vmatmul.mubr.msk.bf16.vlgmr.msra.gmra.mxu0 %vm273_vm0, %v1043_v29  ;;  %v1457_v29 = vpack.c.bf16 %v2558_v26, %v2557_v25 }
  0x61   : > { %2843 = vmatpush3.bf16.msra.mxu0 %v2997_v63  ;;  %2812 = vmatprep.mubr.msk.bf16.mxu0 %vm273_vm0, %v1044_v32  ;;  %v2502_v63 = vld [vmem:[%s3218_s15 + $0x8b] sm:$0xff]  ;;  %v1858_v32 = vpack.c.bf16 %v2600_v28, %v2599_v27 }
  0x62   : > { %2878 = vmatprep.subr.bf16.mxu0 %v2999_v35  ;;  %v1049_v0 = vpack.c.bf16 %v2502_v63, %v2501_v62 }
  0x63   : > { %2827 = vmatmul.mubr.msk.bf16.vlgmr.msra.gmra.mxu1 %vm273_vm0, %v1247_v36 }
  0x64   : > { %2830 = vmatprep.mubr.msk.bf16.mxu1 %vm273_vm0, %v1248_v37  ;;  %2861 = vmatpush3.bf16.msra.mxu1 %v3299_v2  ;;  %v2530_v2 = vld [vmem:[%s3218_s15 + $0x8c] sm:$0xff] }
  0x65   : > { %v1253_v5 = vpack.c.bf16 %v2530_v2, %v2529_v1  ;;  %2896 = vmatprep.subr.bf16.mxu1 %v3000_v55 }
  0x68   : > { %2813 = vmatmul.mubr.msk.bf16.gmra.mxu0 %vm273_vm0, %v1045_v42  ;;  %v2607_v42 = vld [vmem:[%s3218_s15 + $0x66] sm:$0xff] }
  0x69   : > { %2816 = vmatprep.mubr.msk.bf16.mxu0 %vm273_vm0, %v1046_v45  ;;  %v1862_v45 = vpack.c.bf16 %v2608_v43, %v2607_v42 }
  0x6b   : > { %2831 = vmatmul.mubr.msk.bf16.gmra.mxu1 %vm273_vm0, %v1249_v48 }
  0x6c   : > { %2834 = vmatprep.mubr.msk.bf16.mxu1 %vm273_vm0, %v1250_v49 }
  0x70   : > { %2817 = vmatmul.mubr.msk.bf16.gmra.mxu0 %vm273_vm0, %v1047_v54  ;;  %v1865_v54 = vpack.c.bf16 %v2614_v53, %v2613_v52 }
  0x71   : > { %2820 = vmatprep.mubr.msk.bf16.mxu0 %vm273_vm0, %v1048_v57 }
  0x73   : > { %2835 = vmatmul.mubr.msk.bf16.gmra.mxu1 %vm273_vm0, %v1251_v60 }
  0x74   : > { %2838 = vmatprep.mubr.msk.bf16.mxu1 %vm273_vm0, %v1252_v61 }
  0x78   : > { %2821 = vmatmul.mubr.msk.bf16.gmra.mxu0 %vm273_vm0, %v1049_v0 }
  0x79   : > { %2844 = vmatprep.mubr.msk.bf16.mxu0 %vm273_vm0, %v1247_v36  ;;  %v2603_v36 = vld [vmem:[%s3218_s15 + $0x46] sm:$0xff] }
  0x7b   : > { %2839 = vmatmul.mubr.msk.bf16.gmra.mxu1 %vm273_vm0, %v1253_v5 }
  0x7c   : > { %2862 = vmatprep.mubr.msk.bf16.mxu1 %vm273_vm0, %v1654_v6 }
  0x80   : > { %2845 = vmatmul.mubr.msk.bf16.vlgmr.msra.gmra.mxu0 %vm273_vm0, %v1248_v37  ;;  %v2604_v37 = vld [vmem:[%s3218_s15 + $0x4e] sm:$0xff] }
  0x81   : > { %2879 = vmatpush3.bf16.msra.mxu0 %v2999_v35  ;;  %2848 = vmatprep.mubr.msk.bf16.mxu0 %vm273_vm0, %v1249_v48  ;;  %v2602_v35 = vld [vmem:[%s3218_s15 + $0x3e] sm:$0xff]  ;;  %v1860_v39 = vpack.c.bf16 %v2604_v37, %v2603_v36  ;;  %v2611_v48 = vld [vmem:[%s3218_s15 + $0x86] sm:$0xff] }
  0x82   : > { %v1859_v38 = vpack.c.bf16 %v2602_v35, %v2601_v34 }
  0x83   : > { %2863 = vmatmul.mubr.msk.bf16.vlgmr.msra.gmra.mxu1 %vm273_vm0, %v1655_v11 }
  0x84   : > { %2866 = vmatprep.mubr.msk.bf16.mxu1 %vm273_vm0, %v1656_v12  ;;  %2897 = vmatpush3.bf16.msra.mxu1 %v3000_v55 }
  0x85   : > { %2898 = vmatprep.subr.bf16.mxu1 %v3001_v3 }
  0x88   : > { %2849 = vmatmul.mubr.msk.bf16.gmra.mxu0 %vm273_vm0, %v1250_v49  ;;  %v2612_v49 = vld [vmem:[%s3218_s15 + $0x8e] sm:$0xff]  ;;  %2899 = vmatpush3.bf16.msra.mxu1 %v3001_v3  ;;  %s2640_s15 = sshll.u32 %s2280_s14, 7 }
  0x89   : > { %2852 = vmatprep.mubr.msk.bf16.mxu0 %vm273_vm0, %v1251_v60  ;;  %v1864_v51 = vpack.c.bf16 %v2612_v49, %v2611_v48  ;;  %s3642_s17 = scalar_lea.hbm %s3706_s5, %s2640_s15 }
  0x8b   : > { %2867 = vmatmul.mubr.msk.bf16.gmra.mxu1 %vm273_vm0, %v1657_v17 }
  0x8c   : > { %2870 = vmatprep.mubr.msk.bf16.mxu1 %vm273_vm0, %v1658_v18 }
  0x90   : > { %2853 = vmatmul.mubr.msk.bf16.gmra.mxu0 %vm273_vm0, %v1252_v61 }
  0x91   : > { %2856 = vmatprep.mubr.msk.bf16.mxu0 %vm273_vm0, %v1253_v5 }
  0x93   : > { %2871 = vmatmul.mubr.msk.bf16.gmra.mxu1 %vm273_vm0, %v1659_v23 }
  0x94   : > { %2874 = vmatprep.mubr.msk.bf16.mxu1 %vm273_vm0, %v1660_v24 }
  0x98   : > { %2857 = vmatmul.mubr.msk.bf16.gmra.mxu0 %vm273_vm0, %v1457_v29 }
  0x99   : > { %2880 = vmatprep.mubr.msk.bf16.mxu0 %vm273_vm0, %v1858_v32 }
  0x9b   : > { %2875 = vmatmul.mubr.msk.bf16.gmra.mxu1 %vm273_vm0, %v1661_v33 }
  0xa0   : > { %2881 = vmatmul.mubr.msk.bf16.vlgmr.msra.gmra.mxu0 %vm273_vm0, %v1859_v38 }
  0xa1   : > { %2884 = vmatprep.mubr.msk.bf16.mxu0 %vm273_vm0, %v1860_v39 }
  0xa8   : > { %2885 = vmatmul.mubr.msk.bf16.gmra.mxu0 %vm273_vm0, %v1861_v44 }
  0xa9   : > { %2888 = vmatprep.mubr.msk.bf16.mxu0 %vm273_vm0, %v1862_v45 }
  0xb0   : > { %2889 = vmatmul.mubr.msk.bf16.gmra.mxu0 %vm273_vm0, %v1863_v50 }
  0xb1   : > { %2892 = vmatprep.mubr.msk.bf16.mxu0 %vm273_vm0, %v1864_v51 }
  0xb8   : > { %2893 = vmatmul.mubr.msk.bf16.gmra.mxu0 %vm273_vm0, %v1865_v54 }
  0xe0   : > { %v2738_v56 = vpop.f32.mrf.mxu0 }
  0xe1   : > { %398 = vst.msk [vmem:[#allocation2 + $0x10] sm:$0xff] %vm395_vm1, %v2738_v56 }
  0xe2   : > { %v332_v57 = vpop.f32.mrf.mxu0 }
  0xe3   : > { %396 = vst.msk [vmem:[#allocation2] sm:$0xff] %vm395_vm1, %v332_v57  ;;  %v2756_v58 = vpop.f32.mrf.mxu1 }
  0xe4   : > { %v2739_v59 = vpop.f32.mrf.mxu0 }
  0xe5   : > { %399 = vst.msk [vmem:[#allocation2 + $0x18] sm:$0xff] %vm395_vm1, %v2739_v59  ;;  %v505_v60 = vpop.f32.mrf.mxu1 }
  0xe6   : > { %v335_v61 = vpop.f32.mrf.mxu0 }
  0xe7   : > { %397 = vst.msk [vmem:[#allocation2 + $0x8] sm:$0xff] %vm395_vm1, %v335_v61  ;;  %v2757_v62 = vpop.f32.mrf.mxu1 }
  0xe8   : > { %v2742_v63 = vpop.f32.mrf.mxu0  ;;  %v570_v0 = vld [vmem:[#allocation2 + $0x10] sm:$0xff] }
  0xe9   : > { %402 = vst.msk [vmem:[#allocation2 + $0x30] sm:$0xff] %vm395_vm1, %v2742_v63  ;;  %v586_v1 = vadd.f32 %v2756_v58, %v570_v0  ;;  %v508_v2 = vpop.f32.mrf.mxu1 }
  0xea   : > { %v348_v4 = vpop.f32.mrf.mxu0  ;;  %v568_v5 = vld [vmem:[#allocation2] sm:$0xff] }
  0xeb   : > { %602 = vst.msk [vmem:[#allocation2 + $0x10] sm:$0xff] %vm395_vm1, %v586_v1  ;;  %400 = vst.msk [vmem:[#allocation2 + $0x20] sm:$0xff] %vm395_vm1, %v348_v4  ;;  %v584_v6 = vadd.f32 %v568_v5, %v505_v60  ;;  %v2760_v7 = vpop.f32.mrf.mxu1 }
  0xec   : > { %v2743_v8 = vpop.f32.mrf.mxu0  ;;  %v571_v9 = vld [vmem:[#allocation2 + $0x18] sm:$0xff] }
  0xed   : > { %600 = vst.msk [vmem:[#allocation2] sm:$0xff] %vm395_vm1, %v584_v6  ;;  %403 = vst.msk [vmem:[#allocation2 + $0x38] sm:$0xff] %vm395_vm1, %v2743_v8  ;;  %v587_v10 = vadd.f32 %v2757_v62, %v571_v9  ;;  %v521_v11 = vpop.f32.mrf.mxu1 }
  0xee   : > { %v351_v12 = vpop.f32.mrf.mxu0  ;;  %v569_v13 = vld [vmem:[#allocation2 + $0x8] sm:$0xff] }
  0xef   : > { %603 = vst.msk [vmem:[#allocation2 + $0x18] sm:$0xff] %vm395_vm1, %v587_v10  ;;  %401 = vst.msk [vmem:[#allocation2 + $0x28] sm:$0xff] %vm395_vm1, %v351_v12  ;;  %v585_v14 = vadd.f32 %v569_v13, %v508_v2  ;;  %v2761_v15 = vpop.f32.mrf.mxu1 }
  0xf0   : > { %v2746_v16 = vpop.f32.mrf.mxu0  ;;  %v574_v17 = vld [vmem:[#allocation2 + $0x30] sm:$0xff] }
  0xf1   : > { %601 = vst.msk [vmem:[#allocation2 + $0x8] sm:$0xff] %vm395_vm1, %v585_v14  ;;  %406 = vst.msk [vmem:[#allocation2 + $0x50] sm:$0xff] %vm395_vm1, %v2746_v16  ;;  %v590_v18 = vadd.f32 %v2760_v7, %v574_v17  ;;  %v524_v19 = vpop.f32.mrf.mxu1 }
  0xf2   : > { %v364_v20 = vpop.f32.mrf.mxu0  ;;  %v572_v21 = vld [vmem:[#allocation2 + $0x20] sm:$0xff]  ;;  %v774_v50 = vld [vmem:[#allocation2 + $0x10] sm:$0xff] }
  0xf3   : > { %606 = vst.msk [vmem:[#allocation2 + $0x30] sm:$0xff] %vm395_vm1, %v590_v18  ;;  %404 = vst.msk [vmem:[#allocation2 + $0x40] sm:$0xff] %vm395_vm1, %v364_v20  ;;  %v588_v22 = vadd.f32 %v572_v21, %v521_v11  ;;  %v2764_v23 = vpop.f32.mrf.mxu1 }
  0xf4   : > { %v2747_v24 = vpop.f32.mrf.mxu0  ;;  %v575_v25 = vld [vmem:[#allocation2 + $0x38] sm:$0xff]  ;;  %v772_v56 = vld [vmem:[#allocation2] sm:$0xff] }
  0xf5   : > { %604 = vst.msk [vmem:[#allocation2 + $0x20] sm:$0xff] %vm395_vm1, %v588_v22  ;;  %407 = vst.msk [vmem:[#allocation2 + $0x58] sm:$0xff] %vm395_vm1, %v2747_v24  ;;  %v591_v26 = vadd.f32 %v2761_v15, %v575_v25  ;;  %v537_v27 = vpop.f32.mrf.mxu1 }
  0xf6   : > { %v367_v28 = vpop.f32.mrf.mxu0  ;;  %v573_v29 = vld [vmem:[#allocation2 + $0x28] sm:$0xff]  ;;  %v775_v62 = vld [vmem:[#allocation2 + $0x18] sm:$0xff] }
  0xf7   : > { %607 = vst.msk [vmem:[#allocation2 + $0x38] sm:$0xff] %vm395_vm1, %v591_v26  ;;  %405 = vst.msk [vmem:[#allocation2 + $0x48] sm:$0xff] %vm395_vm1, %v367_v28  ;;  %v589_v30 = vadd.f32 %v573_v29, %v524_v19  ;;  %v2765_v31 = vpop.f32.mrf.mxu1 }
  0xf8   : > { %v2750_v32 = vpop.f32.mrf.mxu0  ;;  %v578_v33 = vld [vmem:[#allocation2 + $0x50] sm:$0xff]  ;;  %v773_v4 = vld [vmem:[#allocation2 + $0x8] sm:$0xff] }
  0xf9   : > { %605 = vst.msk [vmem:[#allocation2 + $0x28] sm:$0xff] %vm395_vm1, %v589_v30  ;;  %410 = vst.msk [vmem:[#allocation2 + $0x70] sm:$0xff] %vm395_vm1, %v2750_v32  ;;  %v594_v34 = vadd.f32 %v2764_v23, %v578_v33  ;;  %v540_v35 = vpop.f32.mrf.mxu1 }
  0xfa   : > { %v380_v36 = vpop.f32.mrf.mxu0  ;;  %v576_v37 = vld [vmem:[#allocation2 + $0x40] sm:$0xff]  ;;  %v778_v9 = vld [vmem:[#allocation2 + $0x30] sm:$0xff] }
  0xfb   : > { %610 = vst.msk [vmem:[#allocation2 + $0x50] sm:$0xff] %vm395_vm1, %v594_v34  ;;  %408 = vst.msk [vmem:[#allocation2 + $0x60] sm:$0xff] %vm395_vm1, %v380_v36  ;;  %v592_v38 = vadd.f32 %v576_v37, %v537_v27  ;;  %v2768_v39 = vpop.f32.mrf.mxu1 }
  0xfc   : > { %v2751_v40 = vpop.f32.mrf.mxu0  ;;  %v579_v41 = vld [vmem:[#allocation2 + $0x58] sm:$0xff]  ;;  %v776_v13 = vld [vmem:[#allocation2 + $0x20] sm:$0xff] }
  0xfd   : > { %608 = vst.msk [vmem:[#allocation2 + $0x40] sm:$0xff] %vm395_vm1, %v592_v38  ;;  %411 = vst.msk [vmem:[#allocation2 + $0x78] sm:$0xff] %vm395_vm1, %v2751_v40  ;;  %v595_v42 = vadd.f32 %v2765_v31, %v579_v41  ;;  %v553_v43 = vpop.f32.mrf.mxu1 }
  0xfe   : > { %v383_v44 = vpop.f32.mrf.mxu0  ;;  %v577_v45 = vld [vmem:[#allocation2 + $0x48] sm:$0xff]  ;;  %v779_v19 = vld [vmem:[#allocation2 + $0x38] sm:$0xff] }
  0xff   : > { %611 = vst.msk [vmem:[#allocation2 + $0x58] sm:$0xff] %vm395_vm1, %v595_v42  ;;  %409 = vst.msk [vmem:[#allocation2 + $0x68] sm:$0xff] %vm395_vm1, %v383_v44  ;;  %v593_v46 = vadd.f32 %v577_v45, %v540_v35  ;;  %v2769_v47 = vpop.f32.mrf.mxu1 }
 0x100   : > { %v582_v48 = vld [vmem:[#allocation2 + $0x70] sm:$0xff]  ;;  %v2774_v49 = vpop.f32.mrf.mxu0  ;;  %v777_v25 = vld [vmem:[#allocation2 + $0x28] sm:$0xff] }
 0x101   : > { %609 = vst.msk [vmem:[#allocation2 + $0x48] sm:$0xff] %vm395_vm1, %v593_v46  ;;  %v598_v51 = vadd.f32 %v2768_v39, %v582_v48  ;;  %v790_v52 = vadd.f32 %v2774_v49, %v774_v50  ;;  %v556_v53 = vpop.f32.mrf.mxu1 }
 0x102   : > { %v580_v54 = vld [vmem:[#allocation2 + $0x60] sm:$0xff]  ;;  %v709_v55 = vpop.f32.mrf.mxu0  ;;  %v782_v31 = vld [vmem:[#allocation2 + $0x50] sm:$0xff] }
 0x103   : > { %614 = vst.msk [vmem:[#allocation2 + $0x70] sm:$0xff] %vm395_vm1, %v598_v51  ;;  %806 = vst.msk [vmem:[#allocation2 + $0x10] sm:$0xff] %vm395_vm1, %v790_v52  ;;  %v596_v57 = vadd.f32 %v580_v54, %v553_v43  ;;  %v788_v58 = vadd.f32 %v772_v56, %v709_v55  ;;  %v2792_v59 = vpop.f32.mrf.mxu1 }
 0x104   : > { %v583_v60 = vld [vmem:[#allocation2 + $0x78] sm:$0xff]  ;;  %v2775_v61 = vpop.f32.mrf.mxu0  ;;  %v780_v37 = vld [vmem:[#allocation2 + $0x40] sm:$0xff] }
 0x105   : > { %612 = vst.msk [vmem:[#allocation2 + $0x60] sm:$0xff] %vm395_vm1, %v596_v57  ;;  %804 = vst.msk [vmem:[#allocation2] sm:$0xff] %vm395_vm1, %v788_v58  ;;  %v599_v63 = vadd.f32 %v2769_v47, %v583_v60  ;;  %v791_v0 = vadd.f32 %v2775_v61, %v775_v62  ;;  %v913_v1 = vpop.f32.mrf.mxu1 }
 0x106   : > { %v581_v2 = vld [vmem:[#allocation2 + $0x68] sm:$0xff]  ;;  %v712_v3 = vpop.f32.mrf.mxu0  ;;  %v783_v43 = vld [vmem:[#allocation2 + $0x58] sm:$0xff] }
 0x107   : > { %615 = vst.msk [vmem:[#allocation2 + $0x78] sm:$0xff] %vm395_vm1, %v599_v63  ;;  %807 = vst.msk [vmem:[#allocation2 + $0x18] sm:$0xff] %vm395_vm1, %v791_v0  ;;  %v597_v5 = vadd.f32 %v581_v2, %v556_v53  ;;  %v789_v6 = vadd.f32 %v773_v4, %v712_v3  ;;  %v2793_v7 = vpop.f32.mrf.mxu1 }
 0x108   : > { %v2778_v8 = vpop.f32.mrf.mxu0  ;;  %v781_v49 = vld [vmem:[#allocation2 + $0x48] sm:$0xff] }
 0x109   : > { %613 = vst.msk [vmem:[#allocation2 + $0x68] sm:$0xff] %vm395_vm1, %v597_v5  ;;  %805 = vst.msk [vmem:[#allocation2 + $0x8] sm:$0xff] %vm395_vm1, %v789_v6  ;;  %v794_v10 = vadd.f32 %v2778_v8, %v778_v9  ;;  %v916_v11 = vpop.f32.mrf.mxu1 }
 0x10a   : > { %v725_v12 = vpop.f32.mrf.mxu0  ;;  %v978_v14 = vld [vmem:[#allocation2 + $0x10] sm:$0xff] }
 0x10b   : > { %810 = vst.msk [vmem:[#allocation2 + $0x30] sm:$0xff] %vm395_vm1, %v794_v10  ;;  %v792_v15 = vadd.f32 %v776_v13, %v725_v12  ;;  %v994_v16 = vadd.f32 %v2792_v59, %v978_v14  ;;  %v2796_v17 = vpop.f32.mrf.mxu1  ;;  %v786_v55 = vld [vmem:[#allocation2 + $0x70] sm:$0xff] }
 0x10c   : > { %v2779_v18 = vpop.f32.mrf.mxu0  ;;  %v976_v20 = vld [vmem:[#allocation2] sm:$0xff] }
 0x10d   : > { %808 = vst.msk [vmem:[#allocation2 + $0x20] sm:$0xff] %vm395_vm1, %v792_v15  ;;  %1010 = vst.msk [vmem:[#allocation2 + $0x10] sm:$0xff] %vm395_vm1, %v994_v16  ;;  %v795_v21 = vadd.f32 %v2779_v18, %v779_v19  ;;  %v992_v22 = vadd.f32 %v976_v20, %v913_v1  ;;  %v929_v23 = vpop.f32.mrf.mxu1  ;;  %v784_v61 = vld [vmem:[#allocation2 + $0x60] sm:$0xff] }
 0x10e   : > { %v728_v24 = vpop.f32.mrf.mxu0  ;;  %v979_v26 = vld [vmem:[#allocation2 + $0x18] sm:$0xff] }
 0x10f   : > { %811 = vst.msk [vmem:[#allocation2 + $0x38] sm:$0xff] %vm395_vm1, %v795_v21  ;;  %1008 = vst.msk [vmem:[#allocation2] sm:$0xff] %vm395_vm1, %v992_v22  ;;  %v793_v27 = vadd.f32 %v777_v25, %v728_v24  ;;  %v995_v28 = vadd.f32 %v2793_v7, %v979_v26  ;;  %v2797_v29 = vpop.f32.mrf.mxu1  ;;  %v787_v3 = vld [vmem:[#allocation2 + $0x78] sm:$0xff] }
 0x110   : > { %v2782_v30 = vpop.f32.mrf.mxu0  ;;  %v977_v32 = vld [vmem:[#allocation2 + $0x8] sm:$0xff] }
 0x111   : > { %809 = vst.msk [vmem:[#allocation2 + $0x28] sm:$0xff] %vm395_vm1, %v793_v27  ;;  %1011 = vst.msk [vmem:[#allocation2 + $0x18] sm:$0xff] %vm395_vm1, %v995_v28  ;;  %v798_v33 = vadd.f32 %v2782_v30, %v782_v31  ;;  %v993_v34 = vadd.f32 %v977_v32, %v916_v11  ;;  %v932_v35 = vpop.f32.mrf.mxu1  ;;  %v785_v9 = vld [vmem:[#allocation2 + $0x68] sm:$0xff] }
 0x112   : > { %v741_v36 = vpop.f32.mrf.mxu0  ;;  %v982_v38 = vld [vmem:[#allocation2 + $0x30] sm:$0xff] }
 0x113   : > { %814 = vst.msk [vmem:[#allocation2 + $0x50] sm:$0xff] %vm395_vm1, %v798_v33  ;;  %1009 = vst.msk [vmem:[#allocation2 + $0x8] sm:$0xff] %vm395_vm1, %v993_v34  ;;  %v796_v39 = vadd.f32 %v780_v37, %v741_v36  ;;  %v998_v40 = vadd.f32 %v2796_v17, %v982_v38  ;;  %v2800_v41 = vpop.f32.mrf.mxu1 }
 0x114   : > { %v2783_v42 = vpop.f32.mrf.mxu0  ;;  %v980_v44 = vld [vmem:[#allocation2 + $0x20] sm:$0xff]  ;;  %v1182_v16 = vld [vmem:[#allocation2 + $0x10] sm:$0xff] }
 0x115   : > { %812 = vst.msk [vmem:[#allocation2 + $0x40] sm:$0xff] %vm395_vm1, %v796_v39  ;;  %1014 = vst.msk [vmem:[#allocation2 + $0x30] sm:$0xff] %vm395_vm1, %v998_v40  ;;  %v799_v45 = vadd.f32 %v2783_v42, %v783_v43  ;;  %v996_v46 = vadd.f32 %v980_v44, %v929_v23  ;;  %v945_v47 = vpop.f32.mrf.mxu1 }
 0x116   : > { %v744_v48 = vpop.f32.mrf.mxu0  ;;  %v983_v50 = vld [vmem:[#allocation2 + $0x38] sm:$0xff]  ;;  %v1180_v22 = vld [vmem:[#allocation2] sm:$0xff] }
 0x117   : > { %815 = vst.msk [vmem:[#allocation2 + $0x58] sm:$0xff] %vm395_vm1, %v799_v45  ;;  %1012 = vst.msk [vmem:[#allocation2 + $0x20] sm:$0xff] %vm395_vm1, %v996_v46  ;;  %v797_v51 = vadd.f32 %v781_v49, %v744_v48  ;;  %v999_v52 = vadd.f32 %v2797_v29, %v983_v50  ;;  %v2801_v53 = vpop.f32.mrf.mxu1 }
 0x118   : > { %v2786_v54 = vpop.f32.mrf.mxu0  ;;  %v981_v56 = vld [vmem:[#allocation2 + $0x28] sm:$0xff]  ;;  %v1183_v28 = vld [vmem:[#allocation2 + $0x18] sm:$0xff] }
 0x119   : > { %813 = vst.msk [vmem:[#allocation2 + $0x48] sm:$0xff] %vm395_vm1, %v797_v51  ;;  %1015 = vst.msk [vmem:[#allocation2 + $0x38] sm:$0xff] %vm395_vm1, %v999_v52  ;;  %v802_v57 = vadd.f32 %v2786_v54, %v786_v55  ;;  %v997_v58 = vadd.f32 %v981_v56, %v932_v35  ;;  %v948_v59 = vpop.f32.mrf.mxu1 }
 0x11a   : > { %v757_v60 = vpop.f32.mrf.mxu0  ;;  %v986_v62 = vld [vmem:[#allocation2 + $0x50] sm:$0xff]  ;;  %v1181_v34 = vld [vmem:[#allocation2 + $0x8] sm:$0xff] }
 0x11b   : > { %818 = vst.msk [vmem:[#allocation2 + $0x70] sm:$0xff] %vm395_vm1, %v802_v57  ;;  %1013 = vst.msk [vmem:[#allocation2 + $0x28] sm:$0xff] %vm395_vm1, %v997_v58  ;;  %v800_v63 = vadd.f32 %v784_v61, %v757_v60  ;;  %v1002_v0 = vadd.f32 %v2800_v41, %v986_v62  ;;  %v2804_v1 = vpop.f32.mrf.mxu1 }
 0x11c   : > { %v2787_v2 = vpop.f32.mrf.mxu0  ;;  %v984_v4 = vld [vmem:[#allocation2 + $0x40] sm:$0xff]  ;;  %v1186_v40 = vld [vmem:[#allocation2 + $0x30] sm:$0xff] }
 0x11d   : > { %816 = vst.msk [vmem:[#allocation2 + $0x60] sm:$0xff] %vm395_vm1, %v800_v63  ;;  %1018 = vst.msk [vmem:[#allocation2 + $0x50] sm:$0xff] %vm395_vm1, %v1002_v0  ;;  %v803_v5 = vadd.f32 %v2787_v2, %v787_v3  ;;  %v1000_v6 = vadd.f32 %v984_v4, %v945_v47  ;;  %v961_v7 = vpop.f32.mrf.mxu1 }
 0x11e   : > { %v760_v8 = vpop.f32.mrf.mxu0  ;;  %v987_v10 = vld [vmem:[#allocation2 + $0x58] sm:$0xff]  ;;  %v1184_v45 = vld [vmem:[#allocation2 + $0x20] sm:$0xff] }
 0x11f   : > { %819 = vst.msk [vmem:[#allocation2 + $0x78] sm:$0xff] %vm395_vm1, %v803_v5  ;;  %1016 = vst.msk [vmem:[#allocation2 + $0x40] sm:$0xff] %vm395_vm1, %v1000_v6  ;;  %v801_v11 = vadd.f32 %v785_v9, %v760_v8  ;;  %v1003_v12 = vadd.f32 %v2801_v53, %v987_v10  ;;  %v2805_v13 = vpop.f32.mrf.mxu1 }
 0x120   : > { %v985_v14 = vld [vmem:[#allocation2 + $0x48] sm:$0xff]  ;;  %v2810_v15 = vpop.f32.mrf.mxu0  ;;  %v1187_v51 = vld [vmem:[#allocation2 + $0x38] sm:$0xff] }
 0x121   : > { %817 = vst.msk [vmem:[#allocation2 + $0x68] sm:$0xff] %vm395_vm1, %v801_v11  ;;  %1019 = vst.msk [vmem:[#allocation2 + $0x58] sm:$0xff] %vm395_vm1, %v1003_v12  ;;  %v1001_v17 = vadd.f32 %v985_v14, %v948_v59  ;;  %v1198_v18 = vadd.f32 %v2810_v15, %v1182_v16  ;;  %v964_v19 = vpop.f32.mrf.mxu1 }
 0x122   : > { %v990_v20 = vld [vmem:[#allocation2 + $0x70] sm:$0xff]  ;;  %v1117_v21 = vpop.f32.mrf.mxu0  ;;  %v1185_v57 = vld [vmem:[#allocation2 + $0x28] sm:$0xff] }
 0x123   : > { %1017 = vst.msk [vmem:[#allocation2 + $0x48] sm:$0xff] %vm395_vm1, %v1001_v17  ;;  %1214 = vst.msk [vmem:[#allocation2 + $0x10] sm:$0xff] %vm395_vm1, %v1198_v18  ;;  %v1006_v23 = vadd.f32 %v2804_v1, %v990_v20  ;;  %v1196_v24 = vadd.f32 %v1180_v22, %v1117_v21  ;;  %v2828_v25 = vpop.f32.mrf.mxu1 }
 0x124   : > { %v988_v26 = vld [vmem:[#allocation2 + $0x60] sm:$0xff]  ;;  %v2811_v27 = vpop.f32.mrf.mxu0  ;;  %v1190_v63 = vld [vmem:[#allocation2 + $0x50] sm:$0xff] }
 0x125   : > { %1022 = vst.msk [vmem:[#allocation2 + $0x70] sm:$0xff] %vm395_vm1, %v1006_v23  ;;  %1212 = vst.msk [vmem:[#allocation2] sm:$0xff] %vm395_vm1, %v1196_v24  ;;  %v1004_v29 = vadd.f32 %v988_v26, %v961_v7  ;;  %v1199_v30 = vadd.f32 %v2811_v27, %v1183_v28  ;;  %v1321_v31 = vpop.f32.mrf.mxu1 }
 0x126   : > { %v991_v32 = vld [vmem:[#allocation2 + $0x78] sm:$0xff]  ;;  %v1120_v33 = vpop.f32.mrf.mxu0  ;;  %v1188_v5 = vld [vmem:[#allocation2 + $0x40] sm:$0xff] }
 0x127   : > { %1020 = vst.msk [vmem:[#allocation2 + $0x60] sm:$0xff] %vm395_vm1, %v1004_v29  ;;  %1215 = vst.msk [vmem:[#allocation2 + $0x18] sm:$0xff] %vm395_vm1, %v1199_v30  ;;  %v1007_v35 = vadd.f32 %v2805_v13, %v991_v32  ;;  %v1197_v36 = vadd.f32 %v1181_v34, %v1120_v33  ;;  %v2829_v37 = vpop.f32.mrf.mxu1 }
 0x128   : > { %v989_v38 = vld [vmem:[#allocation2 + $0x68] sm:$0xff]  ;;  %v2814_v39 = vpop.f32.mrf.mxu0  ;;  %v1191_v11 = vld [vmem:[#allocation2 + $0x58] sm:$0xff] }
 0x129   : > { %1023 = vst.msk [vmem:[#allocation2 + $0x78] sm:$0xff] %vm395_vm1, %v1007_v35  ;;  %1213 = vst.msk [vmem:[#allocation2 + $0x8] sm:$0xff] %vm395_vm1, %v1197_v36  ;;  %v1005_v41 = vadd.f32 %v989_v38, %v964_v19  ;;  %v1202_v42 = vadd.f32 %v2814_v39, %v1186_v40  ;;  %v1324_v43 = vpop.f32.mrf.mxu1 }
 0x12a   : > { %v1133_v44 = vpop.f32.mrf.mxu0  ;;  %v1386_v46 = vld [vmem:[#allocation2 + $0x10] sm:$0xff]  ;;  %v1189_v17 = vld [vmem:[#allocation2 + $0x48] sm:$0xff] }
 0x12b   : > { %1021 = vst.msk [vmem:[#allocation2 + $0x68] sm:$0xff] %vm395_vm1, %v1005_v41  ;;  %1218 = vst.msk [vmem:[#allocation2 + $0x30] sm:$0xff] %vm395_vm1, %v1202_v42  ;;  %v1200_v47 = vadd.f32 %v1184_v45, %v1133_v44  ;;  %v1402_v48 = vadd.f32 %v2828_v25, %v1386_v46  ;;  %v2832_v49 = vpop.f32.mrf.mxu1 }
 0x12c   : > { %v2815_v50 = vpop.f32.mrf.mxu0  ;;  %v1384_v52 = vld [vmem:[#allocation2] sm:$0xff]  ;;  %v1194_v23 = vld [vmem:[#allocation2 + $0x70] sm:$0xff] }
 0x12d   : > { %1216 = vst.msk [vmem:[#allocation2 + $0x20] sm:$0xff] %vm395_vm1, %v1200_v47  ;;  %1418 = vst.msk [vmem:[#allocation2 + $0x10] sm:$0xff] %vm395_vm1, %v1402_v48  ;;  %v1203_v53 = vadd.f32 %v2815_v50, %v1187_v51  ;;  %v1400_v54 = vadd.f32 %v1384_v52, %v1321_v31  ;;  %v1337_v55 = vpop.f32.mrf.mxu1 }
 0x12e   : > { %v1136_v56 = vpop.f32.mrf.mxu0  ;;  %v1387_v58 = vld [vmem:[#allocation2 + $0x18] sm:$0xff]  ;;  %v1192_v29 = vld [vmem:[#allocation2 + $0x60] sm:$0xff] }
 0x12f   : > { %1219 = vst.msk [vmem:[#allocation2 + $0x38] sm:$0xff] %vm395_vm1, %v1203_v53  ;;  %1416 = vst.msk [vmem:[#allocation2] sm:$0xff] %vm395_vm1, %v1400_v54  ;;  %v1201_v59 = vadd.f32 %v1185_v57, %v1136_v56  ;;  %v1403_v60 = vadd.f32 %v2829_v37, %v1387_v58  ;;  %v2833_v61 = vpop.f32.mrf.mxu1 }
 0x130   : > { %v2818_v62 = vpop.f32.mrf.mxu0  ;;  %v1385_v0 = vld [vmem:[#allocation2 + $0x8] sm:$0xff]  ;;  %v1195_v35 = vld [vmem:[#allocation2 + $0x78] sm:$0xff] }
 0x131   : > { %1217 = vst.msk [vmem:[#allocation2 + $0x28] sm:$0xff] %vm395_vm1, %v1201_v59  ;;  %1419 = vst.msk [vmem:[#allocation2 + $0x18] sm:$0xff] %vm395_vm1, %v1403_v60  ;;  %v1206_v1 = vadd.f32 %v2818_v62, %v1190_v63  ;;  %v1401_v2 = vadd.f32 %v1385_v0, %v1324_v43  ;;  %v1340_v3 = vpop.f32.mrf.mxu1 }
 0x132   : > { %v1149_v4 = vpop.f32.mrf.mxu0  ;;  %v1390_v6 = vld [vmem:[#allocation2 + $0x30] sm:$0xff]  ;;  %v1193_v41 = vld [vmem:[#allocation2 + $0x68] sm:$0xff] }
 0x133   : > { %1222 = vst.msk [vmem:[#allocation2 + $0x50] sm:$0xff] %vm395_vm1, %v1206_v1  ;;  %1417 = vst.msk [vmem:[#allocation2 + $0x8] sm:$0xff] %vm395_vm1, %v1401_v2  ;;  %v1204_v7 = vadd.f32 %v1188_v5, %v1149_v4  ;;  %v1406_v8 = vadd.f32 %v2832_v49, %v1390_v6  ;;  %v2836_v9 = vpop.f32.mrf.mxu1 }
 0x134   : > { %v2819_v10 = vpop.f32.mrf.mxu0  ;;  %v1388_v12 = vld [vmem:[#allocation2 + $0x20] sm:$0xff]  ;;  %v1590_v48 = vld [vmem:[#allocation2 + $0x10] sm:$0xff] }
 0x135   : > { %1220 = vst.msk [vmem:[#allocation2 + $0x40] sm:$0xff] %vm395_vm1, %v1204_v7  ;;  %1422 = vst.msk [vmem:[#allocation2 + $0x30] sm:$0xff] %vm395_vm1, %v1406_v8  ;;  %v1207_v13 = vadd.f32 %v2819_v10, %v1191_v11  ;;  %v1404_v14 = vadd.f32 %v1388_v12, %v1337_v55  ;;  %v1353_v15 = vpop.f32.mrf.mxu1 }
 0x136   : > { %v1152_v16 = vpop.f32.mrf.mxu0  ;;  %v1391_v18 = vld [vmem:[#allocation2 + $0x38] sm:$0xff]  ;;  %v1588_v54 = vld [vmem:[#allocation2] sm:$0xff] }
 0x137   : > { %1223 = vst.msk [vmem:[#allocation2 + $0x58] sm:$0xff] %vm395_vm1, %v1207_v13  ;;  %1420 = vst.msk [vmem:[#allocation2 + $0x20] sm:$0xff] %vm395_vm1, %v1404_v14  ;;  %v1205_v19 = vadd.f32 %v1189_v17, %v1152_v16  ;;  %v1407_v20 = vadd.f32 %v2833_v61, %v1391_v18  ;;  %v2837_v21 = vpop.f32.mrf.mxu1 }
 0x138   : > { %v2822_v22 = vpop.f32.mrf.mxu0  ;;  %v1389_v24 = vld [vmem:[#allocation2 + $0x28] sm:$0xff]  ;;  %v1591_v60 = vld [vmem:[#allocation2 + $0x18] sm:$0xff] }
 0x139   : > { %1221 = vst.msk [vmem:[#allocation2 + $0x48] sm:$0xff] %vm395_vm1, %v1205_v19  ;;  %1423 = vst.msk [vmem:[#allocation2 + $0x38] sm:$0xff] %vm395_vm1, %v1407_v20  ;;  %v1210_v25 = vadd.f32 %v2822_v22, %v1194_v23  ;;  %v1405_v26 = vadd.f32 %v1389_v24, %v1340_v3  ;;  %v1356_v27 = vpop.f32.mrf.mxu1 }
 0x13a   : > { %v1165_v28 = vpop.f32.mrf.mxu0  ;;  %v1394_v30 = vld [vmem:[#allocation2 + $0x50] sm:$0xff]  ;;  %v1589_v2 = vld [vmem:[#allocation2 + $0x8] sm:$0xff] }
 0x13b   : > { %1226 = vst.msk [vmem:[#allocation2 + $0x70] sm:$0xff] %vm395_vm1, %v1210_v25  ;;  %1421 = vst.msk [vmem:[#allocation2 + $0x28] sm:$0xff] %vm395_vm1, %v1405_v26  ;;  %v1208_v31 = vadd.f32 %v1192_v29, %v1165_v28  ;;  %v1410_v32 = vadd.f32 %v2836_v9, %v1394_v30  ;;  %v2840_v33 = vpop.f32.mrf.mxu1 }
 0x13c   : > { %v2823_v34 = vpop.f32.mrf.mxu0  ;;  %v1392_v36 = vld [vmem:[#allocation2 + $0x40] sm:$0xff]  ;;  %v1594_v8 = vld [vmem:[#allocation2 + $0x30] sm:$0xff] }
 0x13d   : > { %1224 = vst.msk [vmem:[#allocation2 + $0x60] sm:$0xff] %vm395_vm1, %v1208_v31  ;;  %1426 = vst.msk [vmem:[#allocation2 + $0x50] sm:$0xff] %vm395_vm1, %v1410_v32  ;;  %v1211_v37 = vadd.f32 %v2823_v34, %v1195_v35  ;;  %v1408_v38 = vadd.f32 %v1392_v36, %v1353_v15  ;;  %v1369_v39 = vpop.f32.mrf.mxu1 }
 0x13e   : > { %v1168_v40 = vpop.f32.mrf.mxu0  ;;  %v1395_v42 = vld [vmem:[#allocation2 + $0x58] sm:$0xff]  ;;  %v1592_v13 = vld [vmem:[#allocation2 + $0x20] sm:$0xff] }
 0x13f   : > { %1227 = vst.msk [vmem:[#allocation2 + $0x78] sm:$0xff] %vm395_vm1, %v1211_v37  ;;  %1424 = vst.msk [vmem:[#allocation2 + $0x40] sm:$0xff] %vm395_vm1, %v1408_v38  ;;  %v1209_v43 = vadd.f32 %v1193_v41, %v1168_v40  ;;  %v1411_v44 = vadd.f32 %v2837_v21, %v1395_v42  ;;  %v2841_v45 = vpop.f32.mrf.mxu1 }
 0x140   : > { %v1393_v46 = vld [vmem:[#allocation2 + $0x48] sm:$0xff]  ;;  %v2846_v47 = vpop.f32.mrf.mxu0  ;;  %v1595_v19 = vld [vmem:[#allocation2 + $0x38] sm:$0xff] }
 0x141   : > { %1225 = vst.msk [vmem:[#allocation2 + $0x68] sm:$0xff] %vm395_vm1, %v1209_v43  ;;  %1427 = vst.msk [vmem:[#allocation2 + $0x58] sm:$0xff] %vm395_vm1, %v1411_v44  ;;  %v1409_v49 = vadd.f32 %v1393_v46, %v1356_v27  ;;  %v1606_v50 = vadd.f32 %v2846_v47, %v1590_v48  ;;  %v1372_v51 = vpop.f32.mrf.mxu1 }
 0x142   : > { %v1398_v52 = vld [vmem:[#allocation2 + $0x70] sm:$0xff]  ;;  %v1525_v53 = vpop.f32.mrf.mxu0  ;;  %v1593_v25 = vld [vmem:[#allocation2 + $0x28] sm:$0xff] }
 0x143   : > { %1425 = vst.msk [vmem:[#allocation2 + $0x48] sm:$0xff] %vm395_vm1, %v1409_v49  ;;  %1622 = vst.msk [vmem:[#allocation2 + $0x10] sm:$0xff] %vm395_vm1, %v1606_v50  ;;  %v1414_v55 = vadd.f32 %v2840_v33, %v1398_v52  ;;  %v1604_v56 = vadd.f32 %v1588_v54, %v1525_v53  ;;  %v2864_v57 = vpop.f32.mrf.mxu1 }
 0x144   : > { %v1396_v58 = vld [vmem:[#allocation2 + $0x60] sm:$0xff]  ;;  %v2847_v59 = vpop.f32.mrf.mxu0  ;;  %v1598_v31 = vld [vmem:[#allocation2 + $0x50] sm:$0xff] }
 0x145   : > { %1430 = vst.msk [vmem:[#allocation2 + $0x70] sm:$0xff] %vm395_vm1, %v1414_v55  ;;  %1620 = vst.msk [vmem:[#allocation2] sm:$0xff] %vm395_vm1, %v1604_v56  ;;  %v1412_v61 = vadd.f32 %v1396_v58, %v1369_v39  ;;  %v1607_v62 = vadd.f32 %v2847_v59, %v1591_v60  ;;  %v1729_v63 = vpop.f32.mrf.mxu1 }
 0x146   : > { %v1399_v0 = vld [vmem:[#allocation2 + $0x78] sm:$0xff]  ;;  %v1528_v1 = vpop.f32.mrf.mxu0  ;;  %v1596_v37 = vld [vmem:[#allocation2 + $0x40] sm:$0xff] }
 0x147   : > { %1428 = vst.msk [vmem:[#allocation2 + $0x60] sm:$0xff] %vm395_vm1, %v1412_v61  ;;  %1623 = vst.msk [vmem:[#allocation2 + $0x18] sm:$0xff] %vm395_vm1, %v1607_v62  ;;  %v1415_v3 = vadd.f32 %v2841_v45, %v1399_v0  ;;  %v1605_v4 = vadd.f32 %v1589_v2, %v1528_v1  ;;  %v2865_v5 = vpop.f32.mrf.mxu1 }
 0x148   : > { %v1397_v6 = vld [vmem:[#allocation2 + $0x68] sm:$0xff]  ;;  %v2850_v7 = vpop.f32.mrf.mxu0  ;;  %v1599_v43 = vld [vmem:[#allocation2 + $0x58] sm:$0xff] }
 0x149   : > { %1431 = vst.msk [vmem:[#allocation2 + $0x78] sm:$0xff] %vm395_vm1, %v1415_v3  ;;  %1621 = vst.msk [vmem:[#allocation2 + $0x8] sm:$0xff] %vm395_vm1, %v1605_v4  ;;  %v1413_v9 = vadd.f32 %v1397_v6, %v1372_v51  ;;  %v1610_v10 = vadd.f32 %v2850_v7, %v1594_v8  ;;  %v1732_v11 = vpop.f32.mrf.mxu1 }
 0x14a   : > { %v1541_v12 = vpop.f32.mrf.mxu0  ;;  %v1794_v14 = vld [vmem:[#allocation2 + $0x10] sm:$0xff]  ;;  %v1597_v49 = vld [vmem:[#allocation2 + $0x48] sm:$0xff] }
 0x14b   : > { %1429 = vst.msk [vmem:[#allocation2 + $0x68] sm:$0xff] %vm395_vm1, %v1413_v9  ;;  %1626 = vst.msk [vmem:[#allocation2 + $0x30] sm:$0xff] %vm395_vm1, %v1610_v10  ;;  %v1608_v15 = vadd.f32 %v1592_v13, %v1541_v12  ;;  %v1810_v16 = vadd.f32 %v2864_v57, %v1794_v14  ;;  %v2868_v17 = vpop.f32.mrf.mxu1 }
 0x14c   : > { %v2851_v18 = vpop.f32.mrf.mxu0  ;;  %v1792_v20 = vld [vmem:[#allocation2] sm:$0xff]  ;;  %v1602_v55 = vld [vmem:[#allocation2 + $0x70] sm:$0xff] }
 0x14d   : > { %1624 = vst.msk [vmem:[#allocation2 + $0x20] sm:$0xff] %vm395_vm1, %v1608_v15  ;;  %1826 = vst.msk [vmem:[#allocation2 + $0x10] sm:$0xff] %vm395_vm1, %v1810_v16  ;;  %v1611_v21 = vadd.f32 %v2851_v18, %v1595_v19  ;;  %v1808_v22 = vadd.f32 %v1792_v20, %v1729_v63  ;;  %v1745_v23 = vpop.f32.mrf.mxu1 }
 0x14e   : > { %v1544_v24 = vpop.f32.mrf.mxu0  ;;  %v1795_v26 = vld [vmem:[#allocation2 + $0x18] sm:$0xff]  ;;  %v1600_v61 = vld [vmem:[#allocation2 + $0x60] sm:$0xff] }
 0x14f   : > { %1627 = vst.msk [vmem:[#allocation2 + $0x38] sm:$0xff] %vm395_vm1, %v1611_v21  ;;  %1824 = vst.msk [vmem:[#allocation2] sm:$0xff] %vm395_vm1, %v1808_v22  ;;  %v1609_v27 = vadd.f32 %v1593_v25, %v1544_v24  ;;  %v1811_v28 = vadd.f32 %v2865_v5, %v1795_v26  ;;  %v2869_v29 = vpop.f32.mrf.mxu1 }
 0x150   : > { %v2854_v30 = vpop.f32.mrf.mxu0  ;;  %v1793_v32 = vld [vmem:[#allocation2 + $0x8] sm:$0xff]  ;;  %v1603_v3 = vld [vmem:[#allocation2 + $0x78] sm:$0xff] }
 0x151   : > { %1625 = vst.msk [vmem:[#allocation2 + $0x28] sm:$0xff] %vm395_vm1, %v1609_v27  ;;  %1827 = vst.msk [vmem:[#allocation2 + $0x18] sm:$0xff] %vm395_vm1, %v1811_v28  ;;  %v1614_v33 = vadd.f32 %v2854_v30, %v1598_v31  ;;  %v1809_v34 = vadd.f32 %v1793_v32, %v1732_v11  ;;  %v1748_v35 = vpop.f32.mrf.mxu1 }
 0x152   : > { %v1557_v36 = vpop.f32.mrf.mxu0  ;;  %v1798_v38 = vld [vmem:[#allocation2 + $0x30] sm:$0xff]  ;;  %v1601_v8 = vld [vmem:[#allocation2 + $0x68] sm:$0xff] }
 0x153   : > { %1630 = vst.msk [vmem:[#allocation2 + $0x50] sm:$0xff] %vm395_vm1, %v1614_v33  ;;  %1825 = vst.msk [vmem:[#allocation2 + $0x8] sm:$0xff] %vm395_vm1, %v1809_v34  ;;  %v1612_v39 = vadd.f32 %v1596_v37, %v1557_v36  ;;  %v1814_v40 = vadd.f32 %v2868_v17, %v1798_v38  ;;  %v2872_v41 = vpop.f32.mrf.mxu1 }
 0x154   : > { %v2855_v42 = vpop.f32.mrf.mxu0  ;;  %v1796_v44 = vld [vmem:[#allocation2 + $0x20] sm:$0xff]  ;;  %v1998_v15 = vld [vmem:[#allocation2 + $0x10] sm:$0xff] }
 0x155   : > { %1628 = vst.msk [vmem:[#allocation2 + $0x40] sm:$0xff] %vm395_vm1, %v1612_v39  ;;  %1830 = vst.msk [vmem:[#allocation2 + $0x30] sm:$0xff] %vm395_vm1, %v1814_v40  ;;  %v1615_v45 = vadd.f32 %v2855_v42, %v1599_v43  ;;  %v1812_v46 = vadd.f32 %v1796_v44, %v1745_v23  ;;  %v1761_v47 = vpop.f32.mrf.mxu1 }
 0x156   : > { %v1560_v48 = vpop.f32.mrf.mxu0  ;;  %v1799_v50 = vld [vmem:[#allocation2 + $0x38] sm:$0xff]  ;;  %v1996_v20 = vld [vmem:[#allocation2] sm:$0xff] }
 0x157   : > { %1631 = vst.msk [vmem:[#allocation2 + $0x58] sm:$0xff] %vm395_vm1, %v1615_v45  ;;  %1828 = vst.msk [vmem:[#allocation2 + $0x20] sm:$0xff] %vm395_vm1, %v1812_v46  ;;  %v1613_v51 = vadd.f32 %v1597_v49, %v1560_v48  ;;  %v1815_v52 = vadd.f32 %v2869_v29, %v1799_v50  ;;  %v2873_v53 = vpop.f32.mrf.mxu1 }
 0x158   : > { %v2858_v54 = vpop.f32.mrf.mxu0  ;;  %v1797_v56 = vld [vmem:[#allocation2 + $0x28] sm:$0xff]  ;;  %v1999_v26 = vld [vmem:[#allocation2 + $0x18] sm:$0xff] }
 0x159   : > { %1629 = vst.msk [vmem:[#allocation2 + $0x48] sm:$0xff] %vm395_vm1, %v1613_v51  ;;  %1831 = vst.msk [vmem:[#allocation2 + $0x38] sm:$0xff] %vm395_vm1, %v1815_v52  ;;  %v1618_v57 = vadd.f32 %v2858_v54, %v1602_v55  ;;  %v1813_v58 = vadd.f32 %v1797_v56, %v1748_v35  ;;  %v1764_v59 = vpop.f32.mrf.mxu1 }
 0x15a   : > { %v1573_v60 = vpop.f32.mrf.mxu0  ;;  %v1802_v62 = vld [vmem:[#allocation2 + $0x50] sm:$0xff]  ;;  %v1997_v31 = vld [vmem:[#allocation2 + $0x8] sm:$0xff] }
 0x15b   : > { %1634 = vst.msk [vmem:[#allocation2 + $0x70] sm:$0xff] %vm395_vm1, %v1618_v57  ;;  %1829 = vst.msk [vmem:[#allocation2 + $0x28] sm:$0xff] %vm395_vm1, %v1813_v58  ;;  %v1616_v63 = vadd.f32 %v1600_v61, %v1573_v60  ;;  %v1818_v0 = vadd.f32 %v2872_v41, %v1802_v62  ;;  %v2876_v1 = vpop.f32.mrf.mxu1 }
 0x15c   : > { %v2859_v2 = vpop.f32.mrf.mxu0  ;;  %v1800_v4 = vld [vmem:[#allocation2 + $0x40] sm:$0xff]  ;;  %v2002_v37 = vld [vmem:[#allocation2 + $0x30] sm:$0xff] }
 0x15d   : > { %1632 = vst.msk [vmem:[#allocation2 + $0x60] sm:$0xff] %vm395_vm1, %v1616_v63  ;;  %1834 = vst.msk [vmem:[#allocation2 + $0x50] sm:$0xff] %vm395_vm1, %v1818_v0  ;;  %v1619_v5 = vadd.f32 %v2859_v2, %v1603_v3  ;;  %v1816_v6 = vadd.f32 %v1800_v4, %v1761_v47  ;;  %v1777_v10 = vpop.f32.mrf.mxu1  ;;  %v3578_v47 = vld [vmem:[%s3703_s2] ss:$0 sm:$0xff] }
 0x15e   : > { %v1576_v7 = vpop.f32.mrf.mxu0  ;;  %v1803_v9 = vld [vmem:[#allocation2 + $0x58] sm:$0xff]  ;;  %v2000_v41 = vld [vmem:[#allocation2 + $0x20] sm:$0xff] }
 0x15f   : > { %1635 = vst.msk [vmem:[#allocation2 + $0x78] sm:$0xff] %vm395_vm1, %v1619_v5  ;;  %1832 = vst.msk [vmem:[#allocation2 + $0x40] sm:$0xff] %vm395_vm1, %v1816_v6  ;;  %v1617_v11 = vadd.f32 %v1601_v8, %v1576_v7  ;;  %v1819_v12 = vadd.f32 %v2873_v53, %v1803_v9  ;;  %v2877_v21 = vpop.f32.mrf.mxu1 }
 0x160   : > { %v1801_v13 = vld [vmem:[#allocation2 + $0x48] sm:$0xff]  ;;  %v2882_v14 = vpop.f32.mrf.mxu0  ;;  %v2003_v44 = vld [vmem:[#allocation2 + $0x38] sm:$0xff] }
 0x161   : > { %1633 = vst.msk [vmem:[#allocation2 + $0x68] sm:$0xff] %vm395_vm1, %v1617_v11  ;;  %1835 = vst.msk [vmem:[#allocation2 + $0x58] sm:$0xff] %vm395_vm1, %v1819_v12  ;;  %v1817_v16 = vadd.f32 %v1801_v13, %v1764_v59  ;;  %v2014_v17 = vadd.f32 %v2882_v14, %v1998_v15  ;;  %v1780_v32 = vpop.f32.mrf.mxu1 }
 0x162   : > { %v1806_v18 = vld [vmem:[#allocation2 + $0x70] sm:$0xff]  ;;  %v1933_v19 = vpop.f32.mrf.mxu0  ;;  %v2001_v50 = vld [vmem:[#allocation2 + $0x28] sm:$0xff] }
 0x163   : > { %1833 = vst.msk [vmem:[#allocation2 + $0x48] sm:$0xff] %vm395_vm1, %v1817_v16  ;;  %2030 = vst.msk [vmem:[#allocation2 + $0x10] sm:$0xff] %vm395_vm1, %v2014_v17  ;;  %v1822_v22 = vadd.f32 %v2876_v1, %v1806_v18  ;;  %v2012_v23 = vadd.f32 %v1996_v20, %v1933_v19 }
 0x164   : > { %v1804_v24 = vld [vmem:[#allocation2 + $0x60] sm:$0xff]  ;;  %v2883_v25 = vpop.f32.mrf.mxu0  ;;  %v2006_v56 = vld [vmem:[#allocation2 + $0x50] sm:$0xff] }
 0x165   : > { %1838 = vst.msk [vmem:[#allocation2 + $0x70] sm:$0xff] %vm395_vm1, %v1822_v22  ;;  %2028 = vst.msk [vmem:[#allocation2] sm:$0xff] %vm395_vm1, %v2012_v23  ;;  %v1820_v27 = vadd.f32 %v1804_v24, %v1777_v10  ;;  %v2015_v28 = vadd.f32 %v2883_v25, %v1999_v26 }
 0x166   : > { %v1807_v29 = vld [vmem:[#allocation2 + $0x78] sm:$0xff]  ;;  %v1936_v30 = vpop.f32.mrf.mxu0  ;;  %v2004_v62 = vld [vmem:[#allocation2 + $0x40] sm:$0xff] }
 0x167   : > { %1836 = vst.msk [vmem:[#allocation2 + $0x60] sm:$0xff] %vm395_vm1, %v1820_v27  ;;  %2031 = vst.msk [vmem:[#allocation2 + $0x18] sm:$0xff] %vm395_vm1, %v2015_v28  ;;  %v1823_v33 = vadd.f32 %v2877_v21, %v1807_v29  ;;  %v2013_v34 = vadd.f32 %v1997_v31, %v1936_v30 }
 0x168   : > { %v1805_v35 = vld [vmem:[#allocation2 + $0x68] sm:$0xff]  ;;  %v2886_v36 = vpop.f32.mrf.mxu0  ;;  %v2007_v4 = vld [vmem:[#allocation2 + $0x58] sm:$0xff] }
 0x169   : > { %1839 = vst.msk [vmem:[#allocation2 + $0x78] sm:$0xff] %vm395_vm1, %v1823_v33  ;;  %2029 = vst.msk [vmem:[#allocation2 + $0x8] sm:$0xff] %vm395_vm1, %v2013_v34  ;;  %v1821_v38 = vadd.f32 %v1805_v35, %v1780_v32  ;;  %v2018_v39 = vadd.f32 %v2886_v36, %v2002_v37 }
 0x16a   : > { %v1949_v40 = vpop.f32.mrf.mxu0  ;;  %v2046_v48 = vld [vmem:[#allocation2 + $0x10] sm:$0xff]  ;;  %v2005_v11 = vld [vmem:[#allocation2 + $0x48] sm:$0xff] }
 0x16b   : > { %1837 = vst.msk [vmem:[#allocation2 + $0x68] sm:$0xff] %vm395_vm1, %v1821_v38  ;;  %2034 = vst.msk [vmem:[#allocation2 + $0x30] sm:$0xff] %vm395_vm1, %v2018_v39  ;;  %v2016_v42 = vadd.f32 %v2000_v41, %v1949_v40  ;;  %v2069_v58 = vadd.f32 %v3578_v47, %v2046_v48 }
 0x16c   : > { %v2887_v43 = vpop.f32.mrf.mxu0  ;;  %v2044_v45 = vld [vmem:[#allocation2] sm:$0xff]  ;;  %v2010_v18 = vld [vmem:[#allocation2 + $0x70] sm:$0xff] }
 0x16d   : > { %2032 = vst.msk [vmem:[#allocation2 + $0x20] sm:$0xff] %vm395_vm1, %v2016_v42  ;;  %v2019_v46 = vadd.f32 %v2887_v43, %v2003_v44  ;;  %v2067_v53 = vadd.f32 %v3578_v47, %v2044_v45  ;;  %v2085_v5 = vmax.f32 %v2069_v58, 0.0 }
 0x16e   : > { %v1952_v49 = vpop.f32.mrf.mxu0  ;;  %v2047_v51 = vld [vmem:[#allocation2 + $0x18] sm:$0xff]  ;;  %v2008_v24 = vld [vmem:[#allocation2 + $0x60] sm:$0xff] }
 0x16f   : > { %2035 = vst.msk [vmem:[#allocation2 + $0x38] sm:$0xff] %vm395_vm1, %v2019_v46  ;;  %v2017_v52 = vadd.f32 %v2001_v50, %v1952_v49  ;;  %v2070_v54 = vadd.f32 %v3578_v47, %v2047_v51  ;;  %v2083_v1 = vmax.f32 %v2067_v53, 0.0 }
 0x170   : > { %v2890_v55 = vpop.f32.mrf.mxu0  ;;  %v2045_v57 = vld [vmem:[#allocation2 + $0x8] sm:$0xff]  ;;  %v2011_v30 = vld [vmem:[#allocation2 + $0x78] sm:$0xff] }
 0x171   : > { %2033 = vst.msk [vmem:[#allocation2 + $0x28] sm:$0xff] %vm395_vm1, %v2017_v52  ;;  %v2022_v59 = vadd.f32 %v2890_v55, %v2006_v56  ;;  %v2068_v60 = vadd.f32 %v3578_v47, %v2045_v57  ;;  %v2086_v63 = vmax.f32 %v2070_v54, 0.0 }
 0x172   : > { %v1965_v61 = vpop.f32.mrf.mxu0  ;;  %v2050_v9 = vld [vmem:[#allocation2 + $0x30] sm:$0xff]  ;;  %v2009_v37 = vld [vmem:[#allocation2 + $0x68] sm:$0xff] }
 0x173   : > { %2038 = vst.msk [vmem:[#allocation2 + $0x50] sm:$0xff] %vm395_vm1, %v2022_v59  ;;  %v2020_v0 = vadd.f32 %v2004_v62, %v1965_v61  ;;  %v2084_v2 = vmax.f32 %v2068_v60, 0.0  ;;  %v2100_v12 = vpack.c.bf16 %v2086_v63, %v2085_v5  ;;  %v2073_v20 = vadd.f32 %v3578_v47, %v2050_v9 }
 0x174   : > { %v2891_v3 = vpop.f32.mrf.mxu0  ;;  %v2048_v6 = vld [vmem:[#allocation2 + $0x20] sm:$0xff] }
 0x175   : > { %2036 = vst.msk [vmem:[#allocation2 + $0x40] sm:$0xff] %vm395_vm1, %v2020_v0  ;;  %v2023_v7 = vadd.f32 %v2891_v3, %v2007_v4  ;;  %v2099_v8 = vpack.c.bf16 %v2084_v2, %v2083_v1  ;;  %v2071_v15 = vadd.f32 %v3578_v47, %v2048_v6  ;;  %v2089_v31 = vmax.f32 %v2073_v20, 0.0  ;;  %v2627_v3 = vld [vmem:[%s3705_s4] ss:$0 sm:$0xff] }
 0x176   : > { %v1968_v10 = vpop.f32.mrf.mxu0  ;;  %v2051_v13 = vld [vmem:[#allocation2 + $0x38] sm:$0xff] }
 0x177   : > { %2039 = vst.msk [vmem:[#allocation2 + $0x58] sm:$0xff] %vm395_vm1, %v2023_v7  ;;  %v2021_v14 = vadd.f32 %v2005_v11, %v1968_v10  ;;  %2900 = vmatprep.mubr.msk.bf16.mxu1 %vm395_vm1, %v2099_v8  ;;  %v2074_v16 = vadd.f32 %v3578_v47, %v2051_v13  ;;  %v2087_v27 = vmax.f32 %v2071_v15, 0.0 }
 0x178   : > { %v2894_v17 = vpop.f32.mrf.mxu0  ;;  %2901 = vmatmul.mubr.msk.bf16.vlgmr.msra.gmra.mxu1 %vm395_vm1, %v2100_v12  ;;  %v2049_v19 = vld [vmem:[#allocation2 + $0x28] sm:$0xff] }
 0x179   : > { %2037 = vst.msk [vmem:[#allocation2 + $0x48] sm:$0xff] %vm395_vm1, %v2021_v14  ;;  %v2026_v21 = vadd.f32 %v2894_v17, %v2010_v18  ;;  %v2072_v22 = vadd.f32 %v3578_v47, %v2049_v19  ;;  %v2090_v25 = vmax.f32 %v2074_v16, 0.0 }
 0x17a   : > { %v1981_v23 = vpop.f32.mrf.mxu0  ;;  %v2054_v35 = vld [vmem:[#allocation2 + $0x50] sm:$0xff] }
 0x17b   : > { %2042 = vst.msk [vmem:[#allocation2 + $0x70] sm:$0xff] %vm395_vm1, %v2026_v21  ;;  %v2024_v26 = vadd.f32 %v2008_v24, %v1981_v23  ;;  %v2088_v28 = vmax.f32 %v2072_v22, 0.0  ;;  %v2102_v38 = vpack.c.bf16 %v2090_v25, %v2089_v31  ;;  %v2077_v44 = vadd.f32 %v3578_v47, %v2054_v35 }
 0x17c   : > { %v2895_v29 = vpop.f32.mrf.mxu0  ;;  %v2052_v32 = vld [vmem:[#allocation2 + $0x40] sm:$0xff] }
 0x17d   : > { %2040 = vst.msk [vmem:[#allocation2 + $0x60] sm:$0xff] %vm395_vm1, %v2024_v26  ;;  %v2027_v33 = vadd.f32 %v2895_v29, %v2011_v30  ;;  %v2101_v34 = vpack.c.bf16 %v2088_v28, %v2087_v27  ;;  %v2075_v41 = vadd.f32 %v3578_v47, %v2052_v32  ;;  %v2093_v50 = vmax.f32 %v2077_v44, 0.0 }
 0x17e   : > { %v1984_v36 = vpop.f32.mrf.mxu0  ;;  %v2055_v39 = vld [vmem:[#allocation2 + $0x58] sm:$0xff] }
 0x17f   : > { %2043 = vst.msk [vmem:[#allocation2 + $0x78] sm:$0xff] %vm395_vm1, %v2027_v33  ;;  %v2025_v40 = vadd.f32 %v2009_v37, %v1984_v36  ;;  %2904 = vmatprep.mubr.msk.bf16.mxu1 %vm395_vm1, %v2101_v34  ;;  %v2078_v42 = vadd.f32 %v3578_v47, %v2055_v39  ;;  %v2091_v48 = vmax.f32 %v2075_v41, 0.0 }
 0x180   : > { %2905 = vmatmul.mubr.msk.bf16.gmra.mxu1 %vm395_vm1, %v2102_v38  ;;  %v2053_v43 = vld [vmem:[#allocation2 + $0x48] sm:$0xff] }
 0x181   : > { %2041 = vst.msk [vmem:[#allocation2 + $0x68] sm:$0xff] %vm395_vm1, %v2025_v40  ;;  %v2076_v45 = vadd.f32 %v3578_v47, %v2053_v43  ;;  %v2094_v46 = vmax.f32 %v2078_v42, 0.0 }
 0x182   : > { %v2058_v53 = vld [vmem:[#allocation2 + $0x70] sm:$0xff] }
 0x183   : > { %v2092_v49 = vmax.f32 %v2076_v45, 0.0  ;;  %v2104_v54 = vpack.c.bf16 %v2094_v46, %v2093_v50  ;;  %v2081_v59 = vadd.f32 %v3578_v47, %v2058_v53 }
 0x184   : > { %v2056_v51 = vld [vmem:[#allocation2 + $0x60] sm:$0xff] }
 0x185   : > { %v2103_v52 = vpack.c.bf16 %v2092_v49, %v2091_v48  ;;  %v2079_v56 = vadd.f32 %v3578_v47, %v2056_v51  ;;  %v2097_v0 = vmax.f32 %v2081_v59, 0.0 }
 0x186   : > { %v2059_v55 = vld [vmem:[#allocation2 + $0x78] sm:$0xff] }
 0x187   : > { %2908 = vmatprep.mubr.msk.bf16.mxu1 %vm395_vm1, %v2103_v52  ;;  %v2082_v57 = vadd.f32 %v3578_v47, %v2059_v55  ;;  %v2095_v62 = vmax.f32 %v2079_v56, 0.0 }
 0x188   : > { %2909 = vmatmul.mubr.msk.bf16.gmra.mxu1 %vm395_vm1, %v2104_v54  ;;  %v2057_v58 = vld [vmem:[#allocation2 + $0x68] sm:$0xff] }
 0x189   : > { %v2080_v60 = vadd.f32 %v3578_v47, %v2057_v58  ;;  %v2098_v61 = vmax.f32 %v2082_v57, 0.0 }
 0x18b   : > { %v2096_v63 = vmax.f32 %v2080_v60, 0.0  ;;  %v2106_v2 = vpack.c.bf16 %v2098_v61, %v2097_v0 }
 0x18d   : > { %v2105_v1 = vpack.c.bf16 %v2096_v63, %v2095_v62 }
 0x18f   : > { %2912 = vmatprep.mubr.msk.bf16.mxu1 %vm395_vm1, %v2105_v1 }
 0x190   : > { %2913 = vmatmul.mubr.msk.bf16.gmra.mxu1 %vm395_vm1, %v2106_v2 }
 0x238   : > { %v2902_v4 = vpop.f32.mrf.mxu1 }
 0x239   : > { %v2197_v5 = vadd.f32 %v2902_v4, %v2627_v3 }
 0x23a   : > { %v2188_v47 = vpop.f32.mrf.mxu1 }
 0x23b   : > { %2253 = vst [vmem:[%s3620_s10 + $0x10] sm:$0xff] %v2197_v5  ;;  %v2189_v6 = vadd.f32 %v2627_v3, %v2188_v47 }
 0x23c   : > { %v2903_v7 = vpop.f32.mrf.mxu1 }
 0x23d   : > { %2251 = vst [vmem:[%s3620_s10] sm:$0xff] %v2189_v6  ;;  %v2200_v8 = vadd.f32 %v2903_v7, %v2627_v3 }
 0x23e   : > { %v2191_v9 = vpop.f32.mrf.mxu1 }
 0x23f   : > { %2254 = vst [vmem:[%s3620_s10 + $0x18] sm:$0xff] %v2200_v8  ;;  %v2192_v10 = vadd.f32 %v2627_v3, %v2191_v9 }
 0x240   : > { %v2906_v11 = vpop.f32.mrf.mxu1 }
 0x241   : > { %2252 = vst [vmem:[%s3620_s10 + $0x8] sm:$0xff] %v2192_v10  ;;  %v2213_v12 = vadd.f32 %v2906_v11, %v2627_v3 }
 0x242   : > { %v2204_v13 = vpop.f32.mrf.mxu1 }
 0x243   : > { %2257 = vst [vmem:[%s3620_s10 + $0x30] sm:$0xff] %v2213_v12  ;;  %v2205_v14 = vadd.f32 %v2627_v3, %v2204_v13 }
 0x244   : > { %v2907_v15 = vpop.f32.mrf.mxu1 }
 0x245   : > { %2255 = vst [vmem:[%s3620_s10 + $0x20] sm:$0xff] %v2205_v14  ;;  %v2216_v16 = vadd.f32 %v2907_v15, %v2627_v3 }
 0x246   : > { %v2207_v17 = vpop.f32.mrf.mxu1 }
 0x247   : > { %2258 = vst [vmem:[%s3620_s10 + $0x38] sm:$0xff] %v2216_v16  ;;  %v2208_v18 = vadd.f32 %v2627_v3, %v2207_v17 }
 0x248   : > { %v2910_v19 = vpop.f32.mrf.mxu1 }
 0x249   : > { %2256 = vst [vmem:[%s3620_s10 + $0x28] sm:$0xff] %v2208_v18  ;;  %v2229_v20 = vadd.f32 %v2910_v19, %v2627_v3 }
 0x24a   : > { %v2220_v21 = vpop.f32.mrf.mxu1 }
 0x24b   : > { %2261 = vst [vmem:[%s3620_s10 + $0x50] sm:$0xff] %v2229_v20  ;;  %v2221_v22 = vadd.f32 %v2627_v3, %v2220_v21 }
 0x24c   : > { %v2911_v23 = vpop.f32.mrf.mxu1 }
 0x24d   : > { %2259 = vst [vmem:[%s3620_s10 + $0x40] sm:$0xff] %v2221_v22  ;;  %v2232_v24 = vadd.f32 %v2911_v23, %v2627_v3 }
 0x24e   : > { %v2223_v25 = vpop.f32.mrf.mxu1 }
 0x24f   : > { %2262 = vst [vmem:[%s3620_s10 + $0x58] sm:$0xff] %v2232_v24  ;;  %v2224_v26 = vadd.f32 %v2627_v3, %v2223_v25 }
 0x250   : > { %v2914_v27 = vpop.f32.mrf.mxu1 }
 0x251   : > { %2260 = vst [vmem:[%s3620_s10 + $0x48] sm:$0xff] %v2224_v26  ;;  %v2245_v28 = vadd.f32 %v2914_v27, %v2627_v3 }
 0x252   : > { %v2236_v29 = vpop.f32.mrf.mxu1 }
 0x253   : > { %2265 = vst [vmem:[%s3620_s10 + $0x70] sm:$0xff] %v2245_v28  ;;  %v2237_v30 = vadd.f32 %v2627_v3, %v2236_v29 }
 0x254   : > { %v2915_v31 = vpop.f32.mrf.mxu1 }
 0x255   : > { %2263 = vst [vmem:[%s3620_s10 + $0x60] sm:$0xff] %v2237_v30  ;;  %v2248_v32 = vadd.f32 %v2915_v31, %v2627_v3 }
 0x256   : > { %v2239_v33 = vpop.f32.mrf.mxu1 }
 0x257   : > { %2266 = vst [vmem:[%s3620_s10 + $0x78] sm:$0xff] %v2248_v32  ;;  %v2240_v34 = vadd.f32 %v2627_v3, %v2239_v33 }
 0x259   : > { %2264 = vst [vmem:[%s3620_s10 + $0x68] sm:$0xff] %v2240_v34 }
 0x25a   : > { %3015 = shalt.err (!%p3012_p6)
}
 0x25b   : > { %s3016_s27 = scalar_lea.hbm %s3642_s17, 2048  ;;  %s3020_s14 = scalar_lea.hbm %s3706_s5, 12288 }
 0x25c   : > { %p3017_p7 = scmp.ne.s32.totalorder %s3642_s17, %s3016_s27  ;;  %p3021_p11 = scmp.lt.s32.totalorder %s3642_s17, %s3706_s5 }
 0x25d   : > { %p3022_p12 = scmp.lt.s32.totalorder %s3020_s14, %s3016_s27 }
 0x25e   : > { %p3018_p9 = pnand %p3017_p7, %p3180_p3 }
 0x25f   : > { %p3023_p13 = por %p3022_p12, %p3021_p11 }
 0x260   : > { %p3019_p10 = pneg %p3018_p9 }
 0x262   : > { %p3024_p0 = pnand %p3023_p13, %p3019_p10 }
 0x264   : > { %3027 = shalt.err (!%p3024_p0)
}
 0x265   : > { %s3097_s16 = smov 128   ;;  %s3098_s30 = smov 8  }
 0x266   : > { %2918 = dma.vmem_to_hbm [thread:$0]  (%p3180_p3), %s3644_s22, 2048, %s3642_s17, %s3650_s26, %s3097_s16, %s3097_s16, %s3098_s30  }
 0x267 PF: > { %p2924_p1 = scmp.ge.s32.totalorder %s3094_s25, 2  ;;  %s2298_s8 = sand.u32 1, %s3066_s18  }
 0x268   : > { %s2299_s9 = scalar_lea.sflag [#allocation4], %s2298_s8 }
 0x269   : > { %p2921_p2 = pnand %p2924_p1, %p3189_p8 }
 0x26b   : > { %p2922_p4 = pneg %p2921_p2 }
 0x26d   : > { %3061 = dma.done.wait (%p2922_p4), %s2299_s9, 2048  }
 0x26e   : > { %3063 = vsyncadd (%p2922_p4), %s2299_s9, 4294965248  ;;  %s18_s25 = sadd.s32 1, %s3094_s25   ;;  %s3709_s18 = smov %s3070_s19 }
 0x26f   : > { %p15_p5 = scmp.ge.s32.totalorder %s18_s25, 8   ;;  %s3710_s19 = smov %s3074_s20 }
 0x270   : > { %s3711_s20 = smov %s3198_s11  ;;  %s3712_s21 = smov %s3086_s23 }
 0x271   : > { %s3713_s22 = smov %s3090_s24  ;;  %s3714_s23 = smov %s3717_s28 }
 0x272   : > { %s3715_s24 = smov %s3721_s29  ;;  %17 = sbr.rel (!%p15_p5) target bundleno = 5 (0x5), region = 92 }
 0x277   :  { %2304 = vsyncpa [#allocation4], 1 }
 0x278   :  { %2306 = vsyncpa [#allocation4 + $0x1], 1 }

</bundles_post_ra>
